<compile_context>
chip_gen: v7x
topology: tpu7x:2x2x1
jax: 0.10.0
libtpu: 0.0.40
codegen_flags: <defaults>
</compile_context>

<pallas_src>
import functools

import jax
import jax.numpy as jnp
from jax.experimental import pallas as pl
from jax.experimental.pallas import tpu as pltpu


BN_EPS = 1e-5
GIN_EPS = 0.0          # GINConv default eps
NEG_INF = -1e30        # bias for padded class logits (ignored by log_softmax)


def _round_up(x, m):
    return ((x + m - 1) // m) * m


def _pad2(a, rows, cols, dtype=None):
    """Zero-pad a 2-D array up to (rows, cols), optionally casting dtype."""
    dtype = a.dtype if dtype is None else dtype
    out = jnp.zeros((rows, cols), dtype)
    return out.at[: a.shape[0], : a.shape[1]].set(a.astype(dtype))


def _device_kind():
    try:
        return jax.devices()[0].device_kind.lower()
    except Exception:  # pragma: no cover - defensive
        return ""


# ----------------------------------------------------------------------------
# Fused kernel: all GINConv layers + global_add_pool + MLP head + log_softmax.
# Adjacency is loaded into VMEM once and reused by every layer.
# ----------------------------------------------------------------------------
def gin_fused_kernel(adj_ref, x_ref, pool_ref,
                     w1s_ref, b1s_ref, w2s_ref, b2s_ref,
                     wl1_ref, bl1_ref, wl2_ref, bl2_ref,
                     out_ref, *, n_layers, act_bf16):
    adj = adj_ref[...]            # (Np, Np) bf16 — loaded once, reused per layer
    h = x_ref[...]                # (Np, Dp): bf16 on v6e/v7x, f32 on v5e

    for l in range(n_layers):     # static unroll (n_layers small & fixed)
        # neighborhood aggregation on the MXU: bf16 operands, f32 accumulate
        h_mxu = h if act_bf16 else h.astype(jnp.bfloat16)
        agg = jnp.dot(adj, h_mxu, preferred_element_type=jnp.float32)

        # (1+eps)*h multiply elided at compile time for eps == 0
        if GIN_EPS == 0.0:
            if act_bf16:
                hin = agg.astype(jnp.bfloat16) + h          # bf16 add (v6e/v7x)
            else:
                hin = (agg + h).astype(jnp.bfloat16)        # f32 add, cast at MXU
        else:
            if act_bf16:
                hin = agg.astype(jnp.bfloat16) + jnp.bfloat16(1.0 + GIN_EPS) * h
            else:
                hin = (agg + (1.0 + GIN_EPS) * h).astype(jnp.bfloat16)

        # Linear + folded BatchNorm + ReLU  (bf16 operands, f32 accum/bias)
        z = jnp.dot(hin, w1s_ref[l], preferred_element_type=jnp.float32) + b1s_ref[l]
        z = jnp.maximum(z, 0.0)
        # Linear + ReLU
        z = jnp.dot(z.astype(jnp.bfloat16), w2s_ref[l],
                    preferred_element_type=jnp.float32) + b2s_ref[l]
        h_f32 = jnp.maximum(z, 0.0)
        h = h_f32.astype(jnp.bfloat16) if act_bf16 else h_f32

    # global_add_pool: padded graph rows / padded node columns of P are zero.
    # 0/1 pool matrix is exact in bf16.
    h_mxu = h if act_bf16 else h.astype(jnp.bfloat16)
    pooled = jnp.dot(pool_ref[...], h_mxu, preferred_element_type=jnp.float32)

    # lin1 on pre-summed Wl1 row blocks  (== concat([pooled]*n_layers) @ Wl1)
    y = jnp.dot(pooled.astype(jnp.bfloat16), wl1_ref[...],
                preferred_element_type=jnp.float32) + bl1_ref[...]
    y = jnp.maximum(y, 0.0)
    # TODO(synk): dropout is identity here (eval mode); training dropout is stochastic.

    logits = jnp.dot(y.astype(jnp.bfloat16), wl2_ref[...],
                     preferred_element_type=jnp.float32) + bl2_ref[...]
    m = jnp.max(logits, axis=1, keepdims=True)
    s = logits - m
    lse = jnp.log(jnp.sum(jnp.exp(s), axis=1, keepdims=True))
    out_ref[...] = s - lse


def _vmem_spec():
    return pl.BlockSpec(memory_space=pltpu.MemorySpace.VMEM)


# ----------------------------------------------------------------------------
# Parameter init (deterministic, synthetic) — raw/unfolded, like the nn.Module.
# ----------------------------------------------------------------------------
def _linear_init(key, fan_in, fan_out):
    kw, kb = jax.random.split(key)
    bound = 1.0 / jnp.sqrt(jnp.float32(fan_in))
    w = jax.random.uniform(kw, (fan_in, fan_out), jnp.float32, -bound, bound)
    b = jax.random.uniform(kb, (1, fan_out), jnp.float32, -bound, bound)
    return w, b


def init_gin_params(key, input_dim, dim_h=64, n_layers=3, n_classes=2):
    keys = jax.random.split(key, n_layers + 2)
    convs = []
    in_dim = input_dim
    for i in range(n_layers):
        k1, k2 = jax.random.split(keys[i])
        w1, b1 = _linear_init(k1, in_dim, dim_h)
        w2, b2 = _linear_init(k2, dim_h, dim_h)
        convs.append(dict(
            w1=w1, b1=b1,
            gamma=jnp.ones((1, dim_h), jnp.float32),
            beta=jnp.zeros((1, dim_h), jnp.float32),
            rmean=jnp.zeros((1, dim_h), jnp.float32),
            rvar=jnp.ones((1, dim_h), jnp.float32),
            w2=w2, b2=b2,
        ))
        in_dim = dim_h
    wl1, bl1 = _linear_init(keys[n_layers], dim_h * n_layers, 64)
    wl2, bl2 = _linear_init(keys[n_layers + 1], 64, n_classes)
    head = dict(wl1=wl1, bl1=bl1, wl2=wl2, bl2=bl2)
    return convs, head


# ----------------------------------------------------------------------------
# One-time parameter preparation: fold BN, pad to lane-dense shapes, cast the
# MXU operands to bf16, pre-sum the Wl1 row blocks.  Call ONCE and reuse.
# ----------------------------------------------------------------------------
def prepare_gin_params(conv_params, head_params, input_dim):
    n_layers = len(conv_params)
    dim_h = conv_params[0]["w2"].shape[1]
    head_hidden = head_params["wl1"].shape[1]
    n_classes = head_params["wl2"].shape[1]

    d_pad = _round_up(max(input_dim, dim_h), 128)
    hh_pad = _round_up(head_hidden, 128)
    c_pad = _round_up(n_classes, 128)

    # fold eval-mode BatchNorm into the first linear of each conv MLP, pad+stack
    w1s, b1s, w2s, b2s = [], [], [], []
    for p in conv_params:
        scale = p["gamma"][0] * jax.lax.rsqrt(p["rvar"][0] + BN_EPS)   # (dim_h,)
        w1f = p["w1"] * scale[None, :]
        b1f = (p["b1"][0] - p["rmean"][0]) * scale + p["beta"][0]
        w1s.append(_pad2(w1f, d_pad, d_pad, jnp.bfloat16))
        b1s.append(_pad2(b1f[None, :], 1, d_pad, jnp.float32))
        w2s.append(_pad2(p["w2"], d_pad, d_pad, jnp.bfloat16))
        b2s.append(_pad2(p["b2"], 1, d_pad, jnp.float32))

    # head: concat([pooled]*L) @ Wl1  ==  pooled @ sum_l Wl1[l*dim_h:(l+1)*dim_h]
    wl1_sum = head_params["wl1"].reshape(n_layers, dim_h, head_hidden).sum(axis=0)
    bl2 = jnp.full((1, c_pad), NEG_INF, jnp.float32).at[:, :n_classes].set(
        head_params["bl2"])

    return dict(
        n_layers=n_layers, dim_h=dim_h, n_classes=n_classes,
        d_pad=d_pad, hh_pad=hh_pad, c_pad=c_pad,
        w1s=jnp.stack(w1s), b1s=jnp.stack(b1s),
        w2s=jnp.stack(w2s), b2s=jnp.stack(b2s),
        wl1=_pad2(wl1_sum, d_pad, hh_pad, jnp.bfloat16),
        bl1=_pad2(head_params["bl1"], 1, hh_pad, jnp.float32),
        wl2=_pad2(head_params["wl2"], hh_pad, c_pad, jnp.bfloat16),
        bl2=bl2,
    )


# ----------------------------------------------------------------------------
# Full forward (per-call wrapper: builds padded adjacency / features / pool).
# ----------------------------------------------------------------------------
def gin_forward(x, edge_index, batch, num_graphs, prep):
    n = x.shape[0]
    n_layers = prep["n_layers"]
    d_pad, hh_pad, c_pad = prep["d_pad"], prep["hh_pad"], prep["c_pad"]
    n_classes = prep["n_classes"]

    kind = _device_kind()
    is_v5 = "v5" in kind
    is_v7 = "v7" in kind
    act_bf16 = not is_v5                 # v5e has no bf16 VPU path
    act_dtype = jnp.bfloat16 if act_bf16 else jnp.float32

    # padded sizes: lane dims -> multiples of 128, graph rows -> multiple of 8
    n_pad = _round_up(n, 128)
    g_pad = _round_up(num_graphs, 8)

    src, dst = edge_index[0], edge_index[1]
    # dense adjacency A[dst, src] (edge multiplicity): scatter at (n, n),
    # cast to bf16 (exact small ints), THEN pad — no f32 n_pad^2 pass.
    adj_small = jnp.zeros((n, n), jnp.float32).at[dst, src].add(1.0)
    adj = _pad2(adj_small, n_pad, n_pad, jnp.bfloat16)

    x_pad = _pad2(x, n_pad, d_pad, act_dtype)

    # pooling matrix P[g, i] = 1 iff batch[i] == g; padded nodes get id -1
    batch_pad = jnp.full((n_pad,), -1, jnp.int32).at[:n].set(batch.astype(jnp.int32))
    pool = (batch_pad[None, :] ==
            jnp.arange(g_pad, dtype=jnp.int32)[:, None]).astype(jnp.bfloat16)

    operands = (adj, x_pad, pool,
                prep["w1s"], prep["b1s"], prep["w2s"], prep["b2s"],
                prep["wl1"], prep["bl1"], prep["wl2"], prep["bl2"])

    # generation-aware VMEM limit derived from actual operand footprint
    def _nbytes(a):
        return a.size * a.dtype.itemsize
    operand_bytes = sum(_nbytes(a) for a in operands) + g_pad * c_pad * 4
    interm_bytes = 8 * n_pad * d_pad * 4        # live activations / temps
    vmem_need = operand_bytes + interm_bytes + (4 << 20)
    vmem_cap = (40 << 20) if is_v7 else (100 << 20)   # v7x: 64 MiB physical
    vmem_limit = int(min(max(vmem_need, 32 << 20), vmem_cap))

    kern = functools.partial(gin_fused_kernel, n_layers=n_layers,
                             act_bf16=act_bf16)
    out_pad = pl.pallas_call(
        kern,
        out_shape=jax.ShapeDtypeStruct((g_pad, c_pad), jnp.float32),
        in_specs=[_vmem_spec()] * 11,
        out_specs=_vmem_spec(),
        compiler_params=pltpu.CompilerParams(vmem_limit_bytes=vmem_limit),
    )(*operands)

    return out_pad[:num_graphs, :n_classes]


if __name__ == "__main__":
    key = jax.random.PRNGKey(0)
    k_feat, k_edge, k_param = jax.random.split(key, 3)

    # small graph problem: 16 nodes, 8 input features, 2 graphs, 40 edges
    N, INPUT_DIM, DIM_H, N_LAYERS, G, E = 16, 8, 32, 3, 2, 40

    x = jax.random.normal(k_feat, (N, INPUT_DIM), jnp.float32)

    # keep edges within each graph (graph 0 = nodes 0..7, graph 1 = nodes 8..15)
    ks, kd = jax.random.split(k_edge)
    src0 = jax.random.randint(ks, (E // 2,), 0, N // 2)
    dst0 = jax.random.randint(kd, (E // 2,), 0, N // 2)
    src1 = src0 + N // 2
    dst1 = dst0 + N // 2
    edge_index = jnp.stack([jnp.concatenate([src0, src1]),
                            jnp.concatenate([dst0, dst1])], axis=0).astype(jnp.int32)

    batch = jnp.concatenate([jnp.zeros(N // 2, jnp.int32),
                             jnp.ones(N // 2, jnp.int32)])

    conv_params, head_params = init_gin_params(
        k_param, INPUT_DIM, dim_h=DIM_H, n_layers=N_LAYERS, n_classes=2)

    # one-time parameter prep (BN fold, pad, bf16 cast, Wl1 pre-sum)
    prep = prepare_gin_params(conv_params, head_params, INPUT_DIM)

    out = gin_forward(x, edge_index, batch, G, prep)
    out = jax.block_until_ready(out)

    assert out.shape == (G, 2)
    assert bool(jnp.all(jnp.isfinite(out)))
    # log_softmax rows should sum to ~1 in probability space
    assert bool(jnp.all(jnp.abs(jnp.sum(jnp.exp(out), axis=1) - 1.0) < 1e-3))
    print("KERNEL_OK")
</pallas_src>

<mosaic_0001>
module attributes {stable_mosaic.version = 11 : i64} {
  func.func @gin_fused_kernel(%arg0: memref<128x128xbf16, #tpu.memory_space<vmem>>, %arg1: memref<128x128xbf16, #tpu.memory_space<vmem>>, %arg2: memref<8x128xbf16, #tpu.memory_space<vmem>>, %arg3: memref<3x128x128xbf16, #tpu.memory_space<vmem>>, %arg4: memref<3x1x128xf32, #tpu.memory_space<vmem>>, %arg5: memref<3x128x128xbf16, #tpu.memory_space<vmem>>, %arg6: memref<3x1x128xf32, #tpu.memory_space<vmem>>, %arg7: memref<128x128xbf16, #tpu.memory_space<vmem>>, %arg8: memref<1x128xf32, #tpu.memory_space<vmem>>, %arg9: memref<128x128xbf16, #tpu.memory_space<vmem>>, %arg10: memref<1x128xf32, #tpu.memory_space<vmem>>, %arg11: memref<8x128xf32, #tpu.memory_space<vmem>>) attributes {dimension_semantics = [], scalar_prefetch = 0 : i64, scratch_operands = 0 : i64, tpu.core_type = #tpu.core_type<tc>} {
    %c0 = arith.constant 0 : index
    %c0_0 = arith.constant 0 : index
    %0 = vector.load %arg0[%c0, %c0_0] : memref<128x128xbf16, #tpu.memory_space<vmem>>, vector<128x128xbf16>
    %c0_1 = arith.constant 0 : index
    %c0_2 = arith.constant 0 : index
    %1 = vector.load %arg1[%c0_1, %c0_2] : memref<128x128xbf16, #tpu.memory_space<vmem>>, vector<128x128xbf16>
    %cst = arith.constant dense<0.000000e+00> : vector<128x128xf32>
    %2 = tpu.matmul %0, %1, %cst {dimension_numbers = #tpu.dot_dimension_numbers<[1], [0], [0], [1], [0, 0, 1, 1], [], []>} : vector<128x128xbf16>, vector<128x128xbf16>, vector<128x128xf32> -> vector<128x128xf32>
    %3 = arith.truncf %2 : vector<128x128xf32> to vector<128x128xbf16>
    %4 = arith.addf %3, %1 : vector<128x128xbf16>
    %c0_3 = arith.constant 0 : index
    %c0_4 = arith.constant 0 : index
    %c0_5 = arith.constant 0 : index
    %5 = vector.load %arg3[%c0_3, %c0_4, %c0_5] : memref<3x128x128xbf16, #tpu.memory_space<vmem>>, vector<1x128x128xbf16>
    %6 = vector.shape_cast %5 : vector<1x128x128xbf16> to vector<128x128xbf16>
    %cst_6 = arith.constant dense<0.000000e+00> : vector<128x128xf32>
    %7 = tpu.matmul %4, %6, %cst_6 {dimension_numbers = #tpu.dot_dimension_numbers<[1], [0], [0], [1], [0, 0, 1, 1], [], []>} : vector<128x128xbf16>, vector<128x128xbf16>, vector<128x128xf32> -> vector<128x128xf32>
    %c0_7 = arith.constant 0 : index
    %c0_8 = arith.constant 0 : index
    %c0_9 = arith.constant 0 : index
    %8 = vector.load %arg4[%c0_7, %c0_8, %c0_9] : memref<3x1x128xf32, #tpu.memory_space<vmem>>, vector<1x1x128xf32>
    %9 = vector.shape_cast %8 : vector<1x1x128xf32> to vector<1x128xf32>
    %10 = vector.broadcast %9 : vector<1x128xf32> to vector<128x128xf32>
    %11 = arith.addf %7, %10 : vector<128x128xf32>
    %cst_10 = arith.constant 0.000000e+00 : f32
    %12 = vector.broadcast %cst_10 : f32 to vector<128x128xf32>
    %13 = arith.maximumf %11, %12 : vector<128x128xf32>
    %14 = arith.truncf %13 : vector<128x128xf32> to vector<128x128xbf16>
    %c0_11 = arith.constant 0 : index
    %c0_12 = arith.constant 0 : index
    %c0_13 = arith.constant 0 : index
    %15 = vector.load %arg5[%c0_11, %c0_12, %c0_13] : memref<3x128x128xbf16, #tpu.memory_space<vmem>>, vector<1x128x128xbf16>
    %16 = vector.shape_cast %15 : vector<1x128x128xbf16> to vector<128x128xbf16>
    %cst_14 = arith.constant dense<0.000000e+00> : vector<128x128xf32>
    %17 = tpu.matmul %14, %16, %cst_14 {dimension_numbers = #tpu.dot_dimension_numbers<[1], [0], [0], [1], [0, 0, 1, 1], [], []>} : vector<128x128xbf16>, vector<128x128xbf16>, vector<128x128xf32> -> vector<128x128xf32>
    %c0_15 = arith.constant 0 : index
    %c0_16 = arith.constant 0 : index
    %c0_17 = arith.constant 0 : index
    %18 = vector.load %arg6[%c0_15, %c0_16, %c0_17] : memref<3x1x128xf32, #tpu.memory_space<vmem>>, vector<1x1x128xf32>
    %19 = vector.shape_cast %18 : vector<1x1x128xf32> to vector<1x128xf32>
    %20 = vector.broadcast %19 : vector<1x128xf32> to vector<128x128xf32>
    %21 = arith.addf %17, %20 : vector<128x128xf32>
    %cst_18 = arith.constant 0.000000e+00 : f32
    %22 = vector.broadcast %cst_18 : f32 to vector<128x128xf32>
    %23 = arith.maximumf %21, %22 : vector<128x128xf32>
    %24 = arith.truncf %23 : vector<128x128xf32> to vector<128x128xbf16>
    %cst_19 = arith.constant dense<0.000000e+00> : vector<128x128xf32>
    %25 = tpu.matmul %0, %24, %cst_19 {dimension_numbers = #tpu.dot_dimension_numbers<[1], [0], [0], [1], [0, 0, 1, 1], [], []>} : vector<128x128xbf16>, vector<128x128xbf16>, vector<128x128xf32> -> vector<128x128xf32>
    %26 = arith.truncf %25 : vector<128x128xf32> to vector<128x128xbf16>
    %27 = arith.addf %26, %24 : vector<128x128xbf16>
    %c1 = arith.constant 1 : index
    %c0_20 = arith.constant 0 : index
    %c0_21 = arith.constant 0 : index
    %28 = vector.load %arg3[%c1, %c0_20, %c0_21] : memref<3x128x128xbf16, #tpu.memory_space<vmem>>, vector<1x128x128xbf16>
    %29 = vector.shape_cast %28 : vector<1x128x128xbf16> to vector<128x128xbf16>
    %cst_22 = arith.constant dense<0.000000e+00> : vector<128x128xf32>
    %30 = tpu.matmul %27, %29, %cst_22 {dimension_numbers = #tpu.dot_dimension_numbers<[1], [0], [0], [1], [0, 0, 1, 1], [], []>} : vector<128x128xbf16>, vector<128x128xbf16>, vector<128x128xf32> -> vector<128x128xf32>
    %c1_23 = arith.constant 1 : index
    %c0_24 = arith.constant 0 : index
    %c0_25 = arith.constant 0 : index
    %31 = vector.load %arg4[%c1_23, %c0_24, %c0_25] : memref<3x1x128xf32, #tpu.memory_space<vmem>>, vector<1x1x128xf32>
    %32 = vector.shape_cast %31 : vector<1x1x128xf32> to vector<1x128xf32>
    %33 = vector.broadcast %32 : vector<1x128xf32> to vector<128x128xf32>
    %34 = arith.addf %30, %33 : vector<128x128xf32>
    %cst_26 = arith.constant 0.000000e+00 : f32
    %35 = vector.broadcast %cst_26 : f32 to vector<128x128xf32>
    %36 = arith.maximumf %34, %35 : vector<128x128xf32>
    %37 = arith.truncf %36 : vector<128x128xf32> to vector<128x128xbf16>
    %c1_27 = arith.constant 1 : index
    %c0_28 = arith.constant 0 : index
    %c0_29 = arith.constant 0 : index
    %38 = vector.load %arg5[%c1_27, %c0_28, %c0_29] : memref<3x128x128xbf16, #tpu.memory_space<vmem>>, vector<1x128x128xbf16>
    %39 = vector.shape_cast %38 : vector<1x128x128xbf16> to vector<128x128xbf16>
    %cst_30 = arith.constant dense<0.000000e+00> : vector<128x128xf32>
    %40 = tpu.matmul %37, %39, %cst_30 {dimension_numbers = #tpu.dot_dimension_numbers<[1], [0], [0], [1], [0, 0, 1, 1], [], []>} : vector<128x128xbf16>, vector<128x128xbf16>, vector<128x128xf32> -> vector<128x128xf32>
    %c1_31 = arith.constant 1 : index
    %c0_32 = arith.constant 0 : index
    %c0_33 = arith.constant 0 : index
    %41 = vector.load %arg6[%c1_31, %c0_32, %c0_33] : memref<3x1x128xf32, #tpu.memory_space<vmem>>, vector<1x1x128xf32>
    %42 = vector.shape_cast %41 : vector<1x1x128xf32> to vector<1x128xf32>
    %43 = vector.broadcast %42 : vector<1x128xf32> to vector<128x128xf32>
    %44 = arith.addf %40, %43 : vector<128x128xf32>
    %cst_34 = arith.constant 0.000000e+00 : f32
    %45 = vector.broadcast %cst_34 : f32 to vector<128x128xf32>
    %46 = arith.maximumf %44, %45 : vector<128x128xf32>
    %47 = arith.truncf %46 : vector<128x128xf32> to vector<128x128xbf16>
    %cst_35 = arith.constant dense<0.000000e+00> : vector<128x128xf32>
    %48 = tpu.matmul %0, %47, %cst_35 {dimension_numbers = #tpu.dot_dimension_numbers<[1], [0], [0], [1], [0, 0, 1, 1], [], []>} : vector<128x128xbf16>, vector<128x128xbf16>, vector<128x128xf32> -> vector<128x128xf32>
    %49 = arith.truncf %48 : vector<128x128xf32> to vector<128x128xbf16>
    %50 = arith.addf %49, %47 : vector<128x128xbf16>
    %c2 = arith.constant 2 : index
    %c0_36 = arith.constant 0 : index
    %c0_37 = arith.constant 0 : index
    %51 = vector.load %arg3[%c2, %c0_36, %c0_37] : memref<3x128x128xbf16, #tpu.memory_space<vmem>>, vector<1x128x128xbf16>
    %52 = vector.shape_cast %51 : vector<1x128x128xbf16> to vector<128x128xbf16>
    %cst_38 = arith.constant dense<0.000000e+00> : vector<128x128xf32>
    %53 = tpu.matmul %50, %52, %cst_38 {dimension_numbers = #tpu.dot_dimension_numbers<[1], [0], [0], [1], [0, 0, 1, 1], [], []>} : vector<128x128xbf16>, vector<128x128xbf16>, vector<128x128xf32> -> vector<128x128xf32>
    %c2_39 = arith.constant 2 : index
    %c0_40 = arith.constant 0 : index
    %c0_41 = arith.constant 0 : index
    %54 = vector.load %arg4[%c2_39, %c0_40, %c0_41] : memref<3x1x128xf32, #tpu.memory_space<vmem>>, vector<1x1x128xf32>
    %55 = vector.shape_cast %54 : vector<1x1x128xf32> to vector<1x128xf32>
    %56 = vector.broadcast %55 : vector<1x128xf32> to vector<128x128xf32>
    %57 = arith.addf %53, %56 : vector<128x128xf32>
    %cst_42 = arith.constant 0.000000e+00 : f32
    %58 = vector.broadcast %cst_42 : f32 to vector<128x128xf32>
    %59 = arith.maximumf %57, %58 : vector<128x128xf32>
    %60 = arith.truncf %59 : vector<128x128xf32> to vector<128x128xbf16>
    %c2_43 = arith.constant 2 : index
    %c0_44 = arith.constant 0 : index
    %c0_45 = arith.constant 0 : index
    %61 = vector.load %arg5[%c2_43, %c0_44, %c0_45] : memref<3x128x128xbf16, #tpu.memory_space<vmem>>, vector<1x128x128xbf16>
    %62 = vector.shape_cast %61 : vector<1x128x128xbf16> to vector<128x128xbf16>
    %cst_46 = arith.constant dense<0.000000e+00> : vector<128x128xf32>
    %63 = tpu.matmul %60, %62, %cst_46 {dimension_numbers = #tpu.dot_dimension_numbers<[1], [0], [0], [1], [0, 0, 1, 1], [], []>} : vector<128x128xbf16>, vector<128x128xbf16>, vector<128x128xf32> -> vector<128x128xf32>
    %c2_47 = arith.constant 2 : index
    %c0_48 = arith.constant 0 : index
    %c0_49 = arith.constant 0 : index
    %64 = vector.load %arg6[%c2_47, %c0_48, %c0_49] : memref<3x1x128xf32, #tpu.memory_space<vmem>>, vector<1x1x128xf32>
    %65 = vector.shape_cast %64 : vector<1x1x128xf32> to vector<1x128xf32>
    %66 = vector.broadcast %65 : vector<1x128xf32> to vector<128x128xf32>
    %67 = arith.addf %63, %66 : vector<128x128xf32>
    %cst_50 = arith.constant 0.000000e+00 : f32
    %68 = vector.broadcast %cst_50 : f32 to vector<128x128xf32>
    %69 = arith.maximumf %67, %68 : vector<128x128xf32>
    %70 = arith.truncf %69 : vector<128x128xf32> to vector<128x128xbf16>
    %c0_51 = arith.constant 0 : index
    %c0_52 = arith.constant 0 : index
    %71 = vector.load %arg2[%c0_51, %c0_52] : memref<8x128xbf16, #tpu.memory_space<vmem>>, vector<8x128xbf16>
    %cst_53 = arith.constant dense<0.000000e+00> : vector<8x128xf32>
    %72 = tpu.matmul %71, %70, %cst_53 {dimension_numbers = #tpu.dot_dimension_numbers<[1], [0], [0], [1], [0, 0, 1, 1], [], []>} : vector<8x128xbf16>, vector<128x128xbf16>, vector<8x128xf32> -> vector<8x128xf32>
    %73 = arith.truncf %72 : vector<8x128xf32> to vector<8x128xbf16>
    %c0_54 = arith.constant 0 : index
    %c0_55 = arith.constant 0 : index
    %74 = vector.load %arg7[%c0_54, %c0_55] : memref<128x128xbf16, #tpu.memory_space<vmem>>, vector<128x128xbf16>
    %cst_56 = arith.constant dense<0.000000e+00> : vector<8x128xf32>
    %75 = tpu.matmul %73, %74, %cst_56 {dimension_numbers = #tpu.dot_dimension_numbers<[1], [0], [0], [1], [0, 0, 1, 1], [], []>} : vector<8x128xbf16>, vector<128x128xbf16>, vector<8x128xf32> -> vector<8x128xf32>
    %c0_57 = arith.constant 0 : index
    %c0_58 = arith.constant 0 : index
    %76 = vector.load %arg8[%c0_57, %c0_58] : memref<1x128xf32, #tpu.memory_space<vmem>>, vector<1x128xf32>
    %77 = vector.broadcast %76 : vector<1x128xf32> to vector<8x128xf32>
    %78 = arith.addf %75, %77 : vector<8x128xf32>
    %cst_59 = arith.constant 0.000000e+00 : f32
    %79 = vector.broadcast %cst_59 : f32 to vector<8x128xf32>
    %80 = arith.maximumf %78, %79 : vector<8x128xf32>
    %81 = arith.truncf %80 : vector<8x128xf32> to vector<8x128xbf16>
    %c0_60 = arith.constant 0 : index
    %c0_61 = arith.constant 0 : index
    %82 = vector.load %arg9[%c0_60, %c0_61] : memref<128x128xbf16, #tpu.memory_space<vmem>>, vector<128x128xbf16>
    %cst_62 = arith.constant dense<0.000000e+00> : vector<8x128xf32>
    %83 = tpu.matmul %81, %82, %cst_62 {dimension_numbers = #tpu.dot_dimension_numbers<[1], [0], [0], [1], [0, 0, 1, 1], [], []>} : vector<8x128xbf16>, vector<128x128xbf16>, vector<8x128xf32> -> vector<8x128xf32>
    %c0_63 = arith.constant 0 : index
    %c0_64 = arith.constant 0 : index
    %84 = vector.load %arg10[%c0_63, %c0_64] : memref<1x128xf32, #tpu.memory_space<vmem>>, vector<1x128xf32>
    %85 = vector.broadcast %84 : vector<1x128xf32> to vector<8x128xf32>
    %86 = arith.addf %83, %85 : vector<8x128xf32>
    %cst_65 = arith.constant dense<0xFF800000> : vector<8xf32>
    %87 = vector.multi_reduction <maximumf>, %86, %cst_65 [1] : vector<8x128xf32> to vector<8xf32>
    %88 = vector.shape_cast %87 : vector<8xf32> to vector<8x1xf32>
    %89 = vector.broadcast %88 : vector<8x1xf32> to vector<8x128xf32>
    %90 = arith.subf %86, %89 : vector<8x128xf32>
    %91 = math.exp %90 : vector<8x128xf32>
    %cst_66 = arith.constant dense<0.000000e+00> : vector<8xf32>
    %92 = vector.multi_reduction <add>, %91, %cst_66 [1] : vector<8x128xf32> to vector<8xf32>
    %93 = vector.shape_cast %92 : vector<8xf32> to vector<8x1xf32>
    %94 = math.log %93 : vector<8x1xf32>
    %95 = vector.broadcast %94 : vector<8x1xf32> to vector<8x128xf32>
    %96 = arith.subf %90, %95 : vector<8x128xf32>
    %c0_67 = arith.constant 0 : index
    %c0_68 = arith.constant 0 : index
    %97 = vector.load %arg11[%c0_67, %c0_68] : memref<8x128xf32, #tpu.memory_space<vmem>>, vector<8x128xf32>
    tpu.vector_store %arg11[%c0_67, %c0_68], %96 {strides = array<i32>} : memref<8x128xf32, #tpu.memory_space<vmem>>, vector<8x128xf32>,
    return
  }
}

</mosaic_0001>

<bundles_post_ra>
// kernel: tpu_custom_call.1
= control target key start
LH: loop header
LB: loop body
LE: loop exit
PB: predicated region body
PF: predicated region fallthrough
CT: control target
= control target key end

     0   :  { %16 = vsyncpa [#allocation3], 0  ;;  %s3325_s0 = inlined_call_operand.hbm [shape: bf16[128,128], index: 0, kind: input, shape index: {}]   ;;  %s3326_s1 = inlined_call_operand.hbm [shape: bf16[128,128], index: 1, kind: input, shape index: {}]   ;;  %s3327_s2 = inlined_call_operand.vmem [shape: bf16[8,128], index: 2, kind: input, shape index: {}]   ;;  %s3328_s3 = inlined_call_operand.hbm [shape: bf16[3,128,128], index: 3, kind: input, shape index: {}]   ;;  %s3329_s4 = inlined_call_operand.vmem [shape: f32[3,1,128], index: 4, kind: input, shape index: {}]   ;;  %s3330_s5 = inlined_call_operand.hbm [shape: bf16[3,128,128], index: 5, kind: input, shape index: {}]   ;;  %s3331_s6 = inlined_call_operand.vmem [shape: f32[3,1,128], index: 6, kind: input, shape index: {}]   ;;  %s3332_s7 = inlined_call_operand.hbm [shape: bf16[128,128], index: 7, kind: input, shape index: {}]   ;;  %s3333_s8 = inlined_call_operand.vmem [shape: f32[1,128], index: 8, kind: input, shape index: {}]   ;;  %s3334_s9 = inlined_call_operand.hbm [shape: bf16[128,128], index: 9, kind: input, shape index: {}]   ;;  %s3335_s10 = inlined_call_operand.vmem [shape: f32[1,128], index: 10, kind: input, shape index: {}]   ;;  %s3336_s11 = inlined_call_operand.hbm [shape: f32[8,128], index: 11, kind: output, shape index: {}]  }
   0x1   :  { %17 = vsyncpa [#allocation6], 0 }
   0x2   :  { %18 = vsyncpa [#allocation9], 0 }
   0x3   :  { %19 = vsyncpa [#allocation12], 0 }
   0x4   :  { %20 = vsyncpa [#allocation4], 0  ;;  %s2920_s17 = smov [#allocation5]   ;;  %s2921_s19 = smov [#allocation8]  }
   0x5   :  { %s38_s18 = sshll.u32 %s2920_s17, 4  ;;  %s66_s20 = sshll.u32 %s2921_s19, 4  ;;  %s39_s18 = int_to_ptr.vmem [resolvable:$true] %s38_s18  ;;  %s2991_s20 = int_to_ptr.vmem [resolvable:$true] %s66_s20 }
   0x6   :  { %s2756_s23 = scalar_lea.hbm %s3326_s1, 1024 }
   0x7   :  { %p2757_p0 = scmp.ne.s32.totalorder %s3326_s1, %s2756_s23  ;;  %p2760_p1 = scmp.lt.u32.totalorder %s2756_s23, %s3326_s1 }
   0x9   :  { %p2762_p2 = pnand %p2760_p1, %p2757_p0 }
   0xb   :  { %2765 = shalt.err (!%p2762_p2)
}
   0xc   :  { %s2766_s28 = scalar_lea.vmem %s39_s18, 1024  ;;  %p2771_p4 = scmp.lt.s32.totalorder %s39_s18, %s39_s18 }
   0xd   :  { %p2767_p3 = scmp.ne.s32.totalorder %s39_s18, %s2766_s28  ;;  %p2772_p5 = scmp.lt.s32.totalorder %s2766_s28, %s2766_s28 }
   0xf   :  { %p2773_p6 = por %p2772_p5, %p2771_p4 }
  0x11   :  { %p2774_p7 = pnand %p2773_p6, %p2767_p3 }
  0x13   :  { %2777 = shalt.err (!%p2774_p7)
}
  0x14   :  { %s2922_s29 = smov 64   ;;  %s2923_s30 = smov 4  }
  0x15   :  { %44 = dma.hbm_to_vmem [thread:$0]  %s3326_s1, 1024, %s39_s18, [#allocation6], %s2922_s29, %s2922_s29, %s2923_s30  }
  0x16   :  { %s2778_s16 = scalar_lea.hbm %s3330_s5, 3072 }
  0x17   :  { %p2779_p8 = scmp.ne.s32.totalorder %s3330_s5, %s2778_s16  ;;  %p2782_p9 = scmp.lt.u32.totalorder %s2778_s16, %s3330_s5 }
  0x19   :  { %p2784_p10 = pnand %p2782_p9, %p2779_p8 }
  0x1b   :  { %2787 = shalt.err (!%p2784_p10)
}
  0x1c   :  { %s2788_s23 = scalar_lea.vmem %s2991_s20, 3072  ;;  %p2793_p12 = scmp.lt.s32.totalorder %s2991_s20, %s2991_s20 }
  0x1d   :  { %p2789_p11 = scmp.ne.s32.totalorder %s2991_s20, %s2788_s23  ;;  %p2794_p13 = scmp.lt.s32.totalorder %s2788_s23, %s2788_s23 }
  0x1f   :  { %p2795_p0 = por %p2794_p13, %p2793_p12 }
  0x21   :  { %p2796_p1 = pnand %p2795_p0, %p2789_p11 }
  0x23   :  { %2799 = shalt.err (!%p2796_p1)
}
  0x24   :  { %72 = dma.hbm_to_vmem [thread:$0]  %s3330_s5, 3072, %s2991_s20, [#allocation9], %s2922_s29, %s2922_s29, %s2923_s30  }
  0x25   :  { %s2924_s24 = smov [#allocation2]   ;;  %s2925_s26 = smov [#allocation7]  }
  0x26   :  { %s26_s25 = sshll.u32 %s2924_s24, 4  ;;  %s52_s27 = sshll.u32 %s2925_s26, 4  ;;  %s27_s25 = int_to_ptr.vmem [resolvable:$true] %s26_s25  ;;  %s3028_s27 = int_to_ptr.vmem [resolvable:$true] %s52_s27 }
  0x27   :  { %s2800_s13 = scalar_lea.hbm %s3325_s0, 1024 }
  0x28   :  { %p2801_p2 = scmp.ne.s32.totalorder %s3325_s0, %s2800_s13  ;;  %p2804_p3 = scmp.lt.u32.totalorder %s2800_s13, %s3325_s0 }
  0x2a   :  { %p2806_p4 = pnand %p2804_p3, %p2801_p2 }
  0x2c   :  { %2809 = shalt.err (!%p2806_p4)
}
  0x2d   :  { %s2810_s5 = scalar_lea.vmem %s27_s25, 1024  ;;  %p2815_p6 = scmp.lt.s32.totalorder %s27_s25, %s27_s25 }
  0x2e   :  { %p2811_p5 = scmp.ne.s32.totalorder %s27_s25, %s2810_s5  ;;  %p2816_p7 = scmp.lt.s32.totalorder %s2810_s5, %s2810_s5 }
  0x30   :  { %p2817_p8 = por %p2816_p7, %p2815_p6 }
  0x32   :  { %p2818_p9 = pnand %p2817_p8, %p2811_p5 }
  0x34   :  { %2821 = shalt.err (!%p2818_p9)
}
  0x35   :  { %32 = dma.hbm_to_vmem [thread:$0]  %s3325_s0, 1024, %s27_s25, [#allocation3], %s2922_s29, %s2922_s29, %s2923_s30  }
  0x36   :  { %s2822_s23 = scalar_lea.hbm %s3328_s3, 3072 }
  0x37   :  { %p2823_p10 = scmp.ne.s32.totalorder %s3328_s3, %s2822_s23  ;;  %p2826_p11 = scmp.lt.u32.totalorder %s2822_s23, %s3328_s3 }
  0x39   :  { %p2828_p12 = pnand %p2826_p11, %p2823_p10 }
  0x3b   :  { %2831 = shalt.err (!%p2828_p12)
}
  0x3c   :  { %s2832_s28 = scalar_lea.vmem %s3028_s27, 3072  ;;  %p2837_p0 = scmp.lt.s32.totalorder %s3028_s27, %s3028_s27 }
  0x3d   :  { %p2833_p13 = scmp.ne.s32.totalorder %s3028_s27, %s2832_s28  ;;  %p2838_p1 = scmp.lt.s32.totalorder %s2832_s28, %s2832_s28 }
  0x3f   :  { %p2839_p2 = por %p2838_p1, %p2837_p0 }
  0x41   :  { %p2840_p3 = pnand %p2839_p2, %p2833_p13 }
  0x43   :  { %2843 = shalt.err (!%p2840_p3)
}
  0x44   :  { %58 = dma.hbm_to_vmem [thread:$0]  %s3328_s3, 3072, %s3028_s27, [#allocation6], %s2922_s29, %s2922_s29, %s2923_s30  }
  0x45   :  { %s2926_s12 = smov [#allocation10]   ;;  %s2927_s14 = smov [#allocation11]  }
  0x46   :  { %s80_s13 = sshll.u32 %s2926_s12, 4  ;;  %s94_s15 = sshll.u32 %s2927_s14, 4  ;;  %s81_s13 = int_to_ptr.vmem [resolvable:$true] %s80_s13  ;;  %s3065_s15 = int_to_ptr.vmem [resolvable:$true] %s94_s15 }
  0x47   :  { %s2844_s5 = scalar_lea.hbm %s3332_s7, 1024 }
  0x48   :  { %p2845_p4 = scmp.ne.s32.totalorder %s3332_s7, %s2844_s5  ;;  %p2848_p5 = scmp.lt.u32.totalorder %s2844_s5, %s3332_s7 }
  0x4a   :  { %p2850_p6 = pnand %p2848_p5, %p2845_p4 }
  0x4c   :  { %2853 = shalt.err (!%p2850_p6)
}
  0x4d   :  { %s2854_s3 = scalar_lea.vmem %s81_s13, 1024  ;;  %p2859_p8 = scmp.lt.s32.totalorder %s81_s13, %s81_s13 }
  0x4e   :  { %p2855_p7 = scmp.ne.s32.totalorder %s81_s13, %s2854_s3  ;;  %p2860_p9 = scmp.lt.s32.totalorder %s2854_s3, %s2854_s3 }
  0x50   :  { %p2861_p10 = por %p2860_p9, %p2859_p8 }
  0x52   :  { %p2862_p11 = pnand %p2861_p10, %p2855_p7 }
  0x54   :  { %2865 = shalt.err (!%p2862_p11)
}
  0x55   :  { %86 = dma.hbm_to_vmem [thread:$0]  %s3332_s7, 1024, %s81_s13, [#allocation9], %s2922_s29, %s2922_s29, %s2923_s30  }
  0x56   :  { %s2866_s24 = scalar_lea.hbm %s3334_s9, 1024 }
  0x57   :  { %p2867_p12 = scmp.ne.s32.totalorder %s3334_s9, %s2866_s24  ;;  %p2870_p13 = scmp.lt.u32.totalorder %s2866_s24, %s3334_s9 }
  0x59   :  { %p2872_p0 = pnand %p2870_p13, %p2867_p12 }
  0x5b   :  { %2875 = shalt.err (!%p2872_p0)
}
  0x5c   :  { %s2876_s12 = scalar_lea.vmem %s3065_s15, 1024  ;;  %p2881_p2 = scmp.lt.s32.totalorder %s3065_s15, %s3065_s15 }
  0x5d   :  { %p2877_p1 = scmp.ne.s32.totalorder %s3065_s15, %s2876_s12  ;;  %p2882_p3 = scmp.lt.s32.totalorder %s2876_s12, %s2876_s12 }
  0x5f   :  { %p2883_p4 = por %p2882_p3, %p2881_p2 }
  0x61   :  { %p2884_p5 = pnand %p2883_p4, %p2877_p1 }
  0x63   :  { %2887 = shalt.err (!%p2884_p5)
}
  0x64   :  { %100 = dma.hbm_to_vmem [thread:$0]  %s3334_s9, 1024, %s3065_s15, [#allocation12], %s2922_s29, %s2922_s29, %s2923_s30  }
  0x65   :  { %2910 = dma.done.wait [#allocation3], 1024  }
  0x66   :  { %2911 = vsyncadd [#allocation3], 4294966272 }
  0x67   :  { %2912 = dma.done.wait [#allocation6], 4096  }
  0x68   :  { %2913 = vsyncadd [#allocation6], 4294963200 }
  0x69   :  { %2914 = dma.done.wait [#allocation9], 4096  }
  0x6a   :  { %2915 = vsyncadd [#allocation9], 4294963200 }
  0x6b   :  { %2916 = dma.done.wait [#allocation12], 1024  }
  0x6c   :  { %2917 = vsyncadd [#allocation12], 4294966272  ;;  %v3102_v0 = vld [vmem:[#allocation5] sm:$0xff]   ;;  %v3104_v1 = vld [vmem:[#allocation5 + $0x8] sm:$0xff]   ;;  %vm2929_vm0 = vmmov 0  }
  0x6d   :  { %2307 = vmatprep.subr.bf16.mxu0 %v3102_v0  ;;  %v3109_v2 = vld [vmem:[#allocation5 + $0x10] sm:$0xff]   ;;  %v3112_v3 = vld [vmem:[#allocation5 + $0x18] sm:$0xff]   ;;  %v3115_v4 = vld [vmem:[#allocation2] sm:$0xff]  }
  0x6e   :  { %2308 = vmatpush3.bf16.msra.mxu0 %v3102_v0  ;;  %2323 = vmatprep.mubr.bf16.mxu0 %v3115_v4  ;;  %v3120_v5 = vld [vmem:[#allocation5 + $0x20] sm:$0xff]   ;;  %v3123_v6 = vld [vmem:[#allocation5 + $0x28] sm:$0xff]   ;;  %v3127_v9 = vld [vmem:[#allocation5 + $0x30] sm:$0xff]  }
  0x6f   :  { %2309 = vmatprep.subr.bf16.mxu0 %v3104_v1  ;;  %v2682_v7 = vld [vmem:[#allocation7] sm:$0xff]   ;;  %v2683_v8 = vld [vmem:[#allocation7 + $0x8] sm:$0xff]   ;;  %v2684_v10 = vld [vmem:[#allocation7 + $0x10] sm:$0xff]  }
  0x70   :  { %2339 = vmatprep.subr.bf16.mxu1 %v2682_v7  ;;  %v3130_v11 = vld [vmem:[#allocation5 + $0x38] sm:$0xff]   ;;  %v2686_v13 = vld [vmem:[#allocation7 + $0x20] sm:$0xff]   ;;  %v3136_v14 = vld [vmem:[#allocation2 + $0x8] sm:$0xff]  }
  0x71   :  { %2340 = vmatpush3.bf16.msra.mxu1 %v2682_v7  ;;  %v2685_v12 = vld [vmem:[#allocation7 + $0x18] sm:$0xff]   ;;  %v3138_v15 = vld [vmem:[#allocation2 + $0x10] sm:$0xff]   ;;  %v2687_v16 = vld [vmem:[#allocation7 + $0x28] sm:$0xff]  }
  0x72   :  { %2310 = vmatpush3.bf16.msra.mxu0 %v3104_v1  ;;  %2341 = vmatprep.subr.bf16.mxu1 %v2683_v8  ;;  %v3143_v17 = vld [vmem:[#allocation2 + $0x18] sm:$0xff]   ;;  %v3145_v18 = vld [vmem:[#allocation2 + $0x20] sm:$0xff]   ;;  %v3149_v19 = vld [vmem:[#allocation2 + $0x28] sm:$0xff]  }
  0x73   :  { %2311 = vmatprep.subr.bf16.mxu0 %v3109_v2  ;;  %v3151_v20 = vld [vmem:[#allocation2 + $0x30] sm:$0xff]   ;;  %v3155_v21 = vld [vmem:[#allocation2 + $0x38] sm:$0xff]   ;;  %v2690_v24 = vld [vmem:[#allocation8] sm:$0xff]  }
  0x74   :  { %v2688_v22 = vld [vmem:[#allocation7 + $0x30] sm:$0xff]   ;;  %v2689_v23 = vld [vmem:[#allocation7 + $0x38] sm:$0xff]   ;;  %v2691_v25 = vld [vmem:[#allocation8 + $0x8] sm:$0xff]  }
  0x75   :  { %2342 = vmatpush3.bf16.msra.mxu1 %v2683_v8  ;;  %v2692_v26 = vld [vmem:[#allocation8 + $0x10] sm:$0xff]   ;;  %v2693_v27 = vld [vmem:[#allocation8 + $0x18] sm:$0xff]   ;;  %v2694_v28 = vld [vmem:[#allocation8 + $0x20] sm:$0xff]  }
  0x76   :  { %2312 = vmatpush3.bf16.msra.mxu0 %v3109_v2  ;;  %2343 = vmatprep.subr.bf16.mxu1 %v2684_v10  ;;  %v2695_v29 = vld [vmem:[#allocation8 + $0x28] sm:$0xff]   ;;  %v2696_v62 = vld [vmem:[#allocation8 + $0x30] sm:$0xff]   ;;  %v2697_v63 = vld [vmem:[#allocation8 + $0x38] sm:$0xff]  }
  0x77   :  { %2313 = vmatprep.subr.bf16.mxu0 %v3112_v3 }
  0x79   :  { %2344 = vmatpush3.bf16.msra.mxu1 %v2684_v10 }
  0x7a   :  { %2314 = vmatpush3.bf16.msra.mxu0 %v3112_v3  ;;  %2345 = vmatprep.subr.bf16.mxu1 %v2685_v12 }
  0x7b   :  { %2315 = vmatprep.subr.bf16.mxu0 %v3120_v5 }
  0x7d   :  { %2346 = vmatpush3.bf16.msra.mxu1 %v2685_v12 }
  0x7e   :  { %2316 = vmatpush3.bf16.msra.mxu0 %v3120_v5  ;;  %2347 = vmatprep.subr.bf16.mxu1 %v2686_v13 }
  0x7f   :  { %2317 = vmatprep.subr.bf16.mxu0 %v3123_v6 }
  0x81   :  { %2348 = vmatpush3.bf16.msra.mxu1 %v2686_v13 }
  0x82   :  { %2318 = vmatpush3.bf16.msra.mxu0 %v3123_v6  ;;  %2349 = vmatprep.subr.bf16.mxu1 %v2687_v16 }
  0x83   :  { %2319 = vmatprep.subr.bf16.mxu0 %v3127_v9 }
  0x85   :  { %2350 = vmatpush3.bf16.msra.mxu1 %v2687_v16 }
  0x86   :  { %2320 = vmatpush3.bf16.msra.mxu0 %v3127_v9  ;;  %2351 = vmatprep.subr.bf16.mxu1 %v2688_v22 }
  0x87   :  { %2321 = vmatprep.subr.bf16.mxu0 %v3130_v11 }
  0x89   :  { %2352 = vmatpush3.bf16.msra.mxu1 %v2688_v22 }
  0x8a   :  { %2322 = vmatpush3.bf16.msra.mxu0 %v3130_v11  ;;  %2353 = vmatprep.subr.bf16.mxu1 %v2689_v23 }
  0x8b   :  { %2371 = vmatprep.subr.bf16.mxu0 %v2690_v24 }
  0x8d   :  { %2324 = vmatmul.mubr.bf16.vlgmr.msra.gmra.mrb[0].mxu0 %v3136_v14  ;;  %2354 = vmatpush3.bf16.msra.mxu1 %v2689_v23 }
  0x8e   :  { %2327 = vmatprep.mubr.bf16.mxu0 %v3138_v15  ;;  %2372 = vmatpush3.bf16.msra.mxu0 %v2690_v24 }
  0x8f   :  { %2373 = vmatprep.subr.bf16.mxu0 %v2691_v25 }
  0x92   :  { %2374 = vmatpush3.bf16.msra.mxu0 %v2691_v25 }
  0x93   :  { %2375 = vmatprep.subr.bf16.mxu0 %v2692_v26 }
  0x95   :  { %2328 = vmatmul.mubr.bf16.gmra.mrb[4].mxu0 %v3143_v17 }
  0x96   :  { %2331 = vmatprep.mubr.bf16.mxu0 %v3145_v18  ;;  %2376 = vmatpush3.bf16.msra.mxu0 %v2692_v26 }
  0x97   :  { %2377 = vmatprep.subr.bf16.mxu0 %v2693_v27 }
  0x9a   :  { %2378 = vmatpush3.bf16.msra.mxu0 %v2693_v27 }
  0x9b   :  { %2379 = vmatprep.subr.bf16.mxu0 %v2694_v28 }
  0x9d   :  { %2332 = vmatmul.mubr.bf16.gmra.mrb[8].mxu0 %v3149_v19 }
  0x9e   :  { %2335 = vmatprep.mubr.bf16.mxu0 %v3151_v20  ;;  %2380 = vmatpush3.bf16.msra.mxu0 %v2694_v28 }
  0x9f   :  { %2381 = vmatprep.subr.bf16.mxu0 %v2695_v29 }
  0xa2   :  { %2382 = vmatpush3.bf16.msra.mxu0 %v2695_v29 }
  0xa3   :  { %2383 = vmatprep.subr.bf16.mxu0 %v2696_v62 }
  0xa5   :  { %2336 = vmatmul.mubr.bf16.gmra.mrb[12].mxu0 %v3155_v21 }
  0xa6   :  { %2384 = vmatpush3.bf16.msra.mxu0 %v2696_v62 }
  0xa7   :  { %2385 = vmatprep.subr.bf16.mxu0 %v2697_v63 }
  0xaa   :  { %2386 = vmatpush3.bf16.msra.mxu0 %v2697_v63 }
 0x160   :  { %v2325_v30 = vpop.f32.mrb[0].mxu0 }
 0x161   :  { %v284_v31 = vpop.f32.mrb[1].mxu0 }
 0x162   :  { %v2326_v32 = vpop.f32.mrb[2].mxu0 }
 0x163   :  { %v348_v33 = vpack.c.bf16 %v2326_v32, %v2325_v30  ;;  %v287_v34 = vpop.f32.mrb[3].mxu0 }
 0x164   :  { %v347_v35 = vpack.c.bf16 %v287_v34, %v284_v31 }
 0x165   :  { %v356_v37 = vadd.bf16 %v3104_v1, %v348_v33 }
 0x166   :  { %v355_v36 = vadd.bf16 %v3102_v0, %v347_v35  ;;  %v2060_v0 = vld [vmem:[%s3329_s4] ss:$0 sm:$0xff] }
 0x168   :  { %v2329_v38 = vpop.f32.mrb[4].mxu0  ;;  %2355 = vmatprep.mubr.bf16.mxu1 %v355_v36 }
 0x169   :  { %v300_v39 = vpop.f32.mrb[5].mxu0  ;;  %2356 = vmatmul.mubr.bf16.vlgmr.msra.gmra.mrb[0].mxu1 %v356_v37 }
 0x16a   :  { %v2330_v40 = vpop.f32.mrb[6].mxu0 }
 0x16b   :  { %v350_v41 = vpack.c.bf16 %v2330_v40, %v2329_v38  ;;  %v303_v42 = vpop.f32.mrb[7].mxu0 }
 0x16c   :  { %v349_v43 = vpack.c.bf16 %v303_v42, %v300_v39 }
 0x16d   :  { %v358_v45 = vadd.bf16 %v3112_v3, %v350_v41 }
 0x16e   :  { %v357_v44 = vadd.bf16 %v3109_v2, %v349_v43 }
 0x170   :  { %v2333_v46 = vpop.f32.mrb[8].mxu0  ;;  %2359 = vmatprep.mubr.bf16.mxu1 %v357_v44 }
 0x171   :  { %v316_v47 = vpop.f32.mrb[9].mxu0  ;;  %2360 = vmatmul.mubr.bf16.gmra.mrb[4].mxu1 %v358_v45 }
 0x172   :  { %v2334_v48 = vpop.f32.mrb[10].mxu0 }
 0x173   :  { %v352_v49 = vpack.c.bf16 %v2334_v48, %v2333_v46  ;;  %v319_v50 = vpop.f32.mrb[11].mxu0 }
 0x174   :  { %v351_v51 = vpack.c.bf16 %v319_v50, %v316_v47 }
 0x175   :  { %v360_v53 = vadd.bf16 %v3123_v6, %v352_v49 }
 0x176   :  { %v359_v52 = vadd.bf16 %v3120_v5, %v351_v51 }
 0x178   :  { %v2337_v54 = vpop.f32.mrb[12].mxu0  ;;  %2363 = vmatprep.mubr.bf16.mxu1 %v359_v52 }
 0x179   :  { %v332_v55 = vpop.f32.mrb[13].mxu0  ;;  %2364 = vmatmul.mubr.bf16.gmra.mrb[8].mxu1 %v360_v53 }
 0x17a   :  { %v2338_v56 = vpop.f32.mrb[14].mxu0 }
 0x17b   :  { %v354_v57 = vpack.c.bf16 %v2338_v56, %v2337_v54  ;;  %v335_v58 = vpop.f32.mrb[15].mxu0 }
 0x17c   :  { %v353_v59 = vpack.c.bf16 %v335_v58, %v332_v55 }
 0x17d   :  { %v362_v61 = vadd.bf16 %v3130_v11, %v354_v57 }
 0x17e   :  { %v361_v60 = vadd.bf16 %v3127_v9, %v353_v59 }
 0x180   :  { %2367 = vmatprep.mubr.bf16.mxu1 %v361_v60 }
 0x181   :  { %2368 = vmatmul.mubr.bf16.gmra.mrb[12].mxu1 %v362_v61 }
 0x182   :  { %2419 = vmatprep.mubr.bf16.mxu1 %v3115_v4 }
 0x23c   :  { %v2357_v1 = vpop.f32.mrb[0].mxu1 }
 0x23d   :  { %v477_v2 = vadd.f32 %v2357_v1, %v2060_v0  ;;  %v468_v3 = vpop.f32.mrb[1].mxu1 }
 0x23e   :  { %v469_v5 = vadd.f32 %v2060_v0, %v468_v3  ;;  %v2358_v6 = vpop.f32.mrb[2].mxu1  ;;  %v2699_v3 = vld [vmem:[#allocation7 + $0x48] sm:$0xff]  }
 0x23f   :  { %v480_v7 = vadd.f32 %v2358_v6, %v2060_v0  ;;  %v471_v8 = vpop.f32.mrb[3].mxu1  ;;  %v533_v10 = vmax.f32 %v477_v2, 0.0  ;;  %v2698_v2 = vld [vmem:[#allocation7 + $0x40] sm:$0xff]   ;;  %v2701_v6 = vld [vmem:[#allocation7 + $0x58] sm:$0xff]  }
 0x240   :  { %v472_v9 = vadd.f32 %v2060_v0, %v471_v8  ;;  %v531_v12 = vmax.f32 %v469_v5, 0.0  ;;  %2435 = vmatprep.subr.bf16.mxu0 %v2698_v2  ;;  %v2700_v5 = vld [vmem:[#allocation7 + $0x50] sm:$0xff]   ;;  %v2069_v8 = vld [vmem:[%s3331_s6] ss:$0 sm:$0xff] }
 0x241   :  { %v534_v11 = vmax.f32 %v480_v7, 0.0  ;;  %v2703_v7 = vld [vmem:[#allocation7 + $0x68] sm:$0xff]  }
 0x242   :  { %v532_v13 = vmax.f32 %v472_v9, 0.0 }
 0x243   :  { %v548_v16 = vpack.c.bf16 %v534_v11, %v533_v10 }
 0x244   :  { %v547_v22 = vpack.c.bf16 %v532_v13, %v531_v12  ;;  %v2361_v23 = vpop.f32.mrb[4].mxu1 }
 0x245   :  { %v493_v24 = vadd.f32 %v2361_v23, %v2060_v0  ;;  %v484_v25 = vpop.f32.mrb[5].mxu1 }
 0x246   :  { %v485_v26 = vadd.f32 %v2060_v0, %v484_v25  ;;  %v2362_v27 = vpop.f32.mrb[6].mxu1  ;;  %2387 = vmatprep.mubr.bf16.mxu0 %v547_v22 }
 0x247   :  { %v496_v28 = vadd.f32 %v2362_v27, %v2060_v0  ;;  %v487_v29 = vpop.f32.mrb[7].mxu1  ;;  %2388 = vmatmul.mubr.bf16.vlgmr.msra.gmra.mrb[16].mxu0 %v548_v16  ;;  %v537_v31 = vmax.f32 %v493_v24, 0.0 }
 0x248   :  { %v488_v30 = vadd.f32 %v2060_v0, %v487_v29  ;;  %v535_v33 = vmax.f32 %v485_v26, 0.0  ;;  %2436 = vmatpush3.bf16.msra.mxu0 %v2698_v2 }
 0x249   :  { %v538_v32 = vmax.f32 %v496_v28, 0.0  ;;  %2437 = vmatprep.subr.bf16.mxu0 %v2699_v3 }
 0x24a   :  { %v536_v34 = vmax.f32 %v488_v30, 0.0 }
 0x24b   :  { %v550_v35 = vpack.c.bf16 %v538_v32, %v537_v31 }
 0x24c   :  { %v549_v36 = vpack.c.bf16 %v536_v34, %v535_v33  ;;  %v2365_v37 = vpop.f32.mrb[8].mxu1  ;;  %2438 = vmatpush3.bf16.msra.mxu0 %v2699_v3 }
 0x24d   :  { %v509_v38 = vadd.f32 %v2365_v37, %v2060_v0  ;;  %v500_v39 = vpop.f32.mrb[9].mxu1  ;;  %2439 = vmatprep.subr.bf16.mxu0 %v2700_v5 }
 0x24e   :  { %v501_v40 = vadd.f32 %v2060_v0, %v500_v39  ;;  %v2366_v41 = vpop.f32.mrb[10].mxu1  ;;  %2391 = vmatprep.mubr.bf16.mxu0 %v549_v36 }
 0x24f   :  { %v512_v42 = vadd.f32 %v2366_v41, %v2060_v0  ;;  %v503_v43 = vpop.f32.mrb[11].mxu1  ;;  %2392 = vmatmul.mubr.bf16.gmra.mrb[20].mxu0 %v550_v35  ;;  %v541_v45 = vmax.f32 %v509_v38, 0.0 }
 0x250   :  { %v504_v44 = vadd.f32 %v2060_v0, %v503_v43  ;;  %v539_v47 = vmax.f32 %v501_v40, 0.0  ;;  %2440 = vmatpush3.bf16.msra.mxu0 %v2700_v5 }
 0x251   :  { %v542_v46 = vmax.f32 %v512_v42, 0.0  ;;  %2441 = vmatprep.subr.bf16.mxu0 %v2701_v6 }
 0x252   :  { %v540_v48 = vmax.f32 %v504_v44, 0.0 }
 0x253   :  { %v552_v49 = vpack.c.bf16 %v542_v46, %v541_v45 }
 0x254   :  { %v551_v50 = vpack.c.bf16 %v540_v48, %v539_v47  ;;  %v2369_v51 = vpop.f32.mrb[12].mxu1  ;;  %2442 = vmatpush3.bf16.msra.mxu0 %v2701_v6 }
 0x255   :  { %v525_v52 = vadd.f32 %v2369_v51, %v2060_v0  ;;  %v516_v53 = vpop.f32.mrb[13].mxu1 }
 0x256   :  { %v517_v54 = vadd.f32 %v2060_v0, %v516_v53  ;;  %v2370_v55 = vpop.f32.mrb[14].mxu1  ;;  %2395 = vmatprep.mubr.bf16.mxu0 %v551_v50 }
 0x257   :  { %v528_v56 = vadd.f32 %v2370_v55, %v2060_v0  ;;  %v519_v57 = vpop.f32.mrb[15].mxu1  ;;  %2396 = vmatmul.mubr.bf16.gmra.mrb[24].mxu0 %v552_v49  ;;  %v545_v59 = vmax.f32 %v525_v52, 0.0 }
 0x258   :  { %v520_v58 = vadd.f32 %v2060_v0, %v519_v57  ;;  %v543_v61 = vmax.f32 %v517_v54, 0.0  ;;  %v2702_v0 = vld [vmem:[#allocation7 + $0x60] sm:$0xff]  }
 0x259   :  { %v546_v60 = vmax.f32 %v528_v56, 0.0  ;;  %2443 = vmatprep.subr.bf16.mxu0 %v2702_v0 }
 0x25a   :  { %v544_v62 = vmax.f32 %v520_v58, 0.0  ;;  %2444 = vmatpush3.bf16.msra.mxu0 %v2702_v0 }
 0x25b   :  { %v554_v63 = vpack.c.bf16 %v546_v60, %v545_v59  ;;  %2445 = vmatprep.subr.bf16.mxu0 %v2703_v7 }
 0x25c   :  { %v553_v1 = vpack.c.bf16 %v544_v62, %v543_v61 }
 0x25e   :  { %2399 = vmatprep.mubr.bf16.mxu0 %v553_v1  ;;  %2446 = vmatpush3.bf16.msra.mxu0 %v2703_v7 }
 0x25f   :  { %2400 = vmatmul.mubr.bf16.gmra.mrb[28].mxu0 %v554_v63 }
 0x31a   :  { %v2389_v9 = vpop.f32.mrb[16].mxu0 }
 0x31b   :  { %v669_v10 = vadd.f32 %v2389_v9, %v2069_v8  ;;  %v660_v11 = vpop.f32.mrb[17].mxu0 }
 0x31c   :  { %v661_v12 = vadd.f32 %v2069_v8, %v660_v11  ;;  %v2390_v13 = vpop.f32.mrb[18].mxu0  ;;  %v2706_v11 = vld [vmem:[#allocation8 + $0x40] sm:$0xff]  }
 0x31d   :  { %v672_v16 = vadd.f32 %v2390_v13, %v2069_v8  ;;  %v663_v22 = vpop.f32.mrb[19].mxu0  ;;  %v725_v24 = vmax.f32 %v669_v10, 0.0  ;;  %v2705_v10 = vld [vmem:[#allocation7 + $0x78] sm:$0xff]  }
 0x31e   :  { %v664_v23 = vadd.f32 %v2069_v8, %v663_v22  ;;  %v723_v26 = vmax.f32 %v661_v12, 0.0 }
 0x31f   :  { %v726_v25 = vmax.f32 %v672_v16, 0.0 }
 0x320   :  { %v724_v27 = vmax.f32 %v664_v23, 0.0 }
 0x321   :  { %v3173_v28 = vpack.c.bf16 %v726_v25, %v725_v24 }
 0x322   :  { %v3175_v29 = vpack.c.bf16 %v724_v27, %v723_v26  ;;  %v2393_v30 = vpop.f32.mrb[20].mxu0 }
 0x323   :  { %v685_v31 = vadd.f32 %v2393_v30, %v2069_v8  ;;  %v676_v32 = vpop.f32.mrb[21].mxu0 }
 0x324   :  { %v677_v33 = vadd.f32 %v2069_v8, %v676_v32  ;;  %v2394_v34 = vpop.f32.mrb[22].mxu0  ;;  %2403 = vmatprep.subr.bf16.mxu1 %v3175_v29 }
 0x325   :  { %v688_v35 = vadd.f32 %v2394_v34, %v2069_v8  ;;  %v679_v36 = vpop.f32.mrb[23].mxu0  ;;  %2404 = vmatpush3.bf16.msra.mxu1 %v3175_v29  ;;  %v729_v38 = vmax.f32 %v685_v31, 0.0 }
 0x326   :  { %v680_v37 = vadd.f32 %v2069_v8, %v679_v36  ;;  %2405 = vmatprep.subr.bf16.mxu1 %v3173_v28  ;;  %v727_v40 = vmax.f32 %v677_v33, 0.0 }
 0x327   :  { %v730_v39 = vmax.f32 %v688_v35, 0.0 }
 0x328   :  { %v728_v41 = vmax.f32 %v680_v37, 0.0 }
 0x329   :  { %v3180_v42 = vpack.c.bf16 %v730_v39, %v729_v38  ;;  %2406 = vmatpush3.bf16.msra.mxu1 %v3173_v28 }
 0x32a   :  { %v3183_v43 = vpack.c.bf16 %v728_v41, %v727_v40  ;;  %v2397_v44 = vpop.f32.mrb[24].mxu0 }
 0x32b   :  { %v701_v45 = vadd.f32 %v2397_v44, %v2069_v8  ;;  %v692_v46 = vpop.f32.mrb[25].mxu0 }
 0x32c   :  { %v693_v47 = vadd.f32 %v2069_v8, %v692_v46  ;;  %v2398_v48 = vpop.f32.mrb[26].mxu0  ;;  %2407 = vmatprep.subr.bf16.mxu1 %v3183_v43 }
 0x32d   :  { %v704_v49 = vadd.f32 %v2398_v48, %v2069_v8  ;;  %v695_v50 = vpop.f32.mrb[27].mxu0  ;;  %2408 = vmatpush3.bf16.msra.mxu1 %v3183_v43  ;;  %v733_v52 = vmax.f32 %v701_v45, 0.0 }
 0x32e   :  { %v696_v51 = vadd.f32 %v2069_v8, %v695_v50  ;;  %2409 = vmatprep.subr.bf16.mxu1 %v3180_v42  ;;  %v731_v54 = vmax.f32 %v693_v47, 0.0  ;;  %v2712_v50 = vld [vmem:[#allocation8 + $0x70] sm:$0xff]  }
 0x32f   :  { %v734_v53 = vmax.f32 %v704_v49, 0.0 }
 0x330   :  { %v732_v55 = vmax.f32 %v696_v51, 0.0  ;;  %v2713_v51 = vld [vmem:[#allocation8 + $0x78] sm:$0xff]  }
 0x331   :  { %v3188_v56 = vpack.c.bf16 %v734_v53, %v733_v52  ;;  %2410 = vmatpush3.bf16.msra.mxu1 %v3180_v42  ;;  %v2079_v52 = vld [vmem:[%s3329_s4 + $0x1] ss:$0 sm:$0xff] }
 0x332   :  { %v3191_v57 = vpack.c.bf16 %v732_v55, %v731_v54  ;;  %v2401_v58 = vpop.f32.mrb[28].mxu0 }
 0x333   :  { %v717_v59 = vadd.f32 %v2401_v58, %v2069_v8  ;;  %v708_v60 = vpop.f32.mrb[29].mxu0 }
 0x334   :  { %v709_v61 = vadd.f32 %v2069_v8, %v708_v60  ;;  %v2402_v62 = vpop.f32.mrb[30].mxu0  ;;  %2411 = vmatprep.subr.bf16.mxu1 %v3191_v57 }
 0x335   :  { %v720_v63 = vadd.f32 %v2402_v62, %v2069_v8  ;;  %v711_v1 = vpop.f32.mrb[31].mxu0  ;;  %2412 = vmatpush3.bf16.msra.mxu1 %v3191_v57  ;;  %v737_v3 = vmax.f32 %v717_v59, 0.0 }
 0x336   :  { %v712_v2 = vadd.f32 %v2069_v8, %v711_v1  ;;  %2413 = vmatprep.subr.bf16.mxu1 %v3188_v56  ;;  %v735_v6 = vmax.f32 %v709_v61, 0.0  ;;  %v2704_v8 = vld [vmem:[#allocation7 + $0x70] sm:$0xff]  }
 0x337   :  { %v738_v5 = vmax.f32 %v720_v63, 0.0  ;;  %2447 = vmatprep.subr.bf16.mxu0 %v2704_v8 }
 0x338   :  { %v736_v0 = vmax.f32 %v712_v2, 0.0  ;;  %2448 = vmatpush3.bf16.msra.mxu0 %v2704_v8 }
 0x339   :  { %v3196_v7 = vpack.c.bf16 %v738_v5, %v737_v3  ;;  %2414 = vmatpush3.bf16.msra.mxu1 %v3188_v56  ;;  %2449 = vmatprep.subr.bf16.mxu0 %v2705_v10 }
 0x33a   :  { %v3199_v9 = vpack.c.bf16 %v736_v0, %v735_v6 }
 0x33c   :  { %2415 = vmatprep.subr.bf16.mxu1 %v3199_v9  ;;  %2450 = vmatpush3.bf16.msra.mxu0 %v2705_v10 }
 0x33d   :  { %2416 = vmatpush3.bf16.msra.mxu1 %v3199_v9 }
 0x33e   :  { %2417 = vmatprep.subr.bf16.mxu1 %v3196_v7 }
 0x341   :  { %2418 = vmatpush3.bf16.msra.mxu1 %v3196_v7 }
 0x342   :  { %2467 = vmatprep.subr.bf16.mxu1 %v2706_v11 }
 0x344   :  { %2420 = vmatmul.mubr.bf16.vlgmr.msra.gmra.mrb[16].mxu1 %v3136_v14  ;;  %v2707_v14 = vld [vmem:[#allocation8 + $0x48] sm:$0xff]  }
 0x345   :  { %2423 = vmatprep.mubr.bf16.mxu1 %v3138_v15  ;;  %2468 = vmatpush3.bf16.msra.mxu1 %v2706_v11  ;;  %v2708_v15 = vld [vmem:[#allocation8 + $0x50] sm:$0xff]  }
 0x346   :  { %2469 = vmatprep.subr.bf16.mxu1 %v2707_v14 }
 0x349   :  { %2470 = vmatpush3.bf16.msra.mxu1 %v2707_v14 }
 0x34a   :  { %2471 = vmatprep.subr.bf16.mxu1 %v2708_v15 }
 0x34c   :  { %2424 = vmatmul.mubr.bf16.gmra.mrb[20].mxu1 %v3143_v17  ;;  %v2709_v17 = vld [vmem:[#allocation8 + $0x58] sm:$0xff]  }
 0x34d   :  { %2427 = vmatprep.mubr.bf16.mxu1 %v3145_v18  ;;  %2472 = vmatpush3.bf16.msra.mxu1 %v2708_v15  ;;  %v2710_v18 = vld [vmem:[#allocation8 + $0x60] sm:$0xff]  }
 0x34e   :  { %2473 = vmatprep.subr.bf16.mxu1 %v2709_v17 }
 0x351   :  { %2474 = vmatpush3.bf16.msra.mxu1 %v2709_v17 }
 0x352   :  { %2475 = vmatprep.subr.bf16.mxu1 %v2710_v18 }
 0x354   :  { %2428 = vmatmul.mubr.bf16.gmra.mrb[24].mxu1 %v3149_v19  ;;  %v2711_v19 = vld [vmem:[#allocation8 + $0x68] sm:$0xff]  }
 0x355   :  { %2431 = vmatprep.mubr.bf16.mxu1 %v3151_v20  ;;  %2476 = vmatpush3.bf16.msra.mxu1 %v2710_v18 }
 0x356   :  { %2477 = vmatprep.subr.bf16.mxu1 %v2711_v19 }
 0x359   :  { %2478 = vmatpush3.bf16.msra.mxu1 %v2711_v19 }
 0x35a   :  { %2479 = vmatprep.subr.bf16.mxu1 %v2712_v50 }
 0x35c   :  { %2432 = vmatmul.mubr.bf16.gmra.mrb[28].mxu1 %v3155_v21 }
 0x35d   :  { %2480 = vmatpush3.bf16.msra.mxu1 %v2712_v50  ;;  %v2718_v50 = vld [vmem:[#allocation7 + $0xa0] sm:$0xff]  }
 0x35e   :  { %2481 = vmatprep.subr.bf16.mxu1 %v2713_v51 }
 0x361   :  { %2482 = vmatpush3.bf16.msra.mxu1 %v2713_v51  ;;  %v2719_v51 = vld [vmem:[#allocation7 + $0xa8] sm:$0xff]  }
 0x417   :  { %v2421_v20 = vpop.f32.mrb[16].mxu1 }
 0x418   :  { %v781_v12 = vpop.f32.mrb[17].mxu1 }
 0x419   :  { %v2422_v13 = vpop.f32.mrb[18].mxu1 }
 0x41a   :  { %v845_v16 = vpack.c.bf16 %v2422_v13, %v2421_v20  ;;  %v784_v22 = vpop.f32.mrb[19].mxu1 }
 0x41b   :  { %v844_v23 = vpack.c.bf16 %v784_v22, %v781_v12 }
 0x41c   :  { %v853_v25 = vadd.bf16 %v845_v16, %v3173_v28 }
 0x41d   :  { %v852_v24 = vadd.bf16 %v844_v23, %v3175_v29 }
 0x41f   :  { %v2425_v26 = vpop.f32.mrb[20].mxu1  ;;  %2451 = vmatprep.mubr.bf16.mxu0 %v852_v24 }
 0x420   :  { %v797_v27 = vpop.f32.mrb[21].mxu1  ;;  %2452 = vmatmul.mubr.bf16.vlgmr.msra.gmra.mrb[32].mxu0 %v853_v25 }
 0x421   :  { %v2426_v30 = vpop.f32.mrb[22].mxu1 }
 0x422   :  { %v847_v31 = vpack.c.bf16 %v2426_v30, %v2425_v26  ;;  %v800_v32 = vpop.f32.mrb[23].mxu1 }
 0x423   :  { %v846_v33 = vpack.c.bf16 %v800_v32, %v797_v27 }
 0x424   :  { %v855_v35 = vadd.bf16 %v847_v31, %v3180_v42 }
 0x425   :  { %v854_v34 = vadd.bf16 %v846_v33, %v3183_v43 }
 0x427   :  { %v2429_v36 = vpop.f32.mrb[24].mxu1  ;;  %2455 = vmatprep.mubr.bf16.mxu0 %v854_v34 }
 0x428   :  { %v813_v37 = vpop.f32.mrb[25].mxu1  ;;  %2456 = vmatmul.mubr.bf16.gmra.mrb[36].mxu0 %v855_v35 }
 0x429   :  { %v2430_v38 = vpop.f32.mrb[26].mxu1 }
 0x42a   :  { %v849_v29 = vpack.c.bf16 %v2430_v38, %v2429_v36  ;;  %v816_v39 = vpop.f32.mrb[27].mxu1 }
 0x42b   :  { %v848_v28 = vpack.c.bf16 %v816_v39, %v813_v37 }
 0x42c   :  { %v857_v41 = vadd.bf16 %v849_v29, %v3188_v56 }
 0x42d   :  { %v856_v40 = vadd.bf16 %v848_v28, %v3191_v57 }
 0x42f   :  { %v2433_v44 = vpop.f32.mrb[28].mxu1  ;;  %2459 = vmatprep.mubr.bf16.mxu0 %v856_v40 }
 0x430   :  { %v829_v45 = vpop.f32.mrb[29].mxu1  ;;  %2460 = vmatmul.mubr.bf16.gmra.mrb[40].mxu0 %v857_v41 }
 0x431   :  { %v2434_v46 = vpop.f32.mrb[30].mxu1 }
 0x432   :  { %v851_v43 = vpack.c.bf16 %v2434_v46, %v2433_v44  ;;  %v832_v47 = vpop.f32.mrb[31].mxu1 }
 0x433   :  { %v850_v42 = vpack.c.bf16 %v832_v47, %v829_v45  ;;  %v2714_v47 = vld [vmem:[#allocation7 + $0x80] sm:$0xff]  }
 0x434   :  { %v859_v49 = vadd.bf16 %v851_v43, %v3196_v7  ;;  %2531 = vmatprep.subr.bf16.mxu1 %v2714_v47 }
 0x435   :  { %v858_v48 = vadd.bf16 %v850_v42, %v3199_v9  ;;  %v2715_v42 = vld [vmem:[#allocation7 + $0x88] sm:$0xff]  }
 0x437   :  { %2463 = vmatprep.mubr.bf16.mxu0 %v858_v48  ;;  %v2716_v48 = vld [vmem:[#allocation7 + $0x90] sm:$0xff]  }
 0x438   :  { %2464 = vmatmul.mubr.bf16.gmra.mrb[44].mxu0 %v859_v49  ;;  %v2717_v49 = vld [vmem:[#allocation7 + $0x98] sm:$0xff]  }
 0x439   :  { %2515 = vmatprep.mubr.bf16.mxu0 %v3115_v4 }
 0x4f3   :  { %v2453_v53 = vpop.f32.mrb[32].mxu0 }
 0x4f4   :  { %v976_v54 = vadd.f32 %v2453_v53, %v2079_v52  ;;  %v967_v55 = vpop.f32.mrb[33].mxu0 }
 0x4f5   :  { %v968_v56 = vadd.f32 %v2079_v52, %v967_v55  ;;  %v2454_v57 = vpop.f32.mrb[34].mxu0 }
 0x4f6   :  { %v979_v58 = vadd.f32 %v2454_v57, %v2079_v52  ;;  %v970_v59 = vpop.f32.mrb[35].mxu0  ;;  %v1032_v61 = vmax.f32 %v976_v54, 0.0 }
 0x4f7   :  { %v971_v60 = vadd.f32 %v2079_v52, %v970_v59  ;;  %v1030_v62 = vmax.f32 %v968_v56, 0.0 }
 0x4f8   :  { %v1033_v4 = vmax.f32 %v979_v58, 0.0 }
 0x4f9   :  { %v1031_v63 = vmax.f32 %v971_v60, 0.0 }
 0x4fa   :  { %v1047_v1 = vpack.c.bf16 %v1033_v4, %v1032_v61 }
 0x4fb   :  { %v1046_v2 = vpack.c.bf16 %v1031_v63, %v1030_v62  ;;  %v2457_v3 = vpop.f32.mrb[36].mxu0 }
 0x4fc   :  { %v992_v5 = vadd.f32 %v2457_v3, %v2079_v52  ;;  %v983_v6 = vpop.f32.mrb[37].mxu0 }
 0x4fd   :  { %v984_v0 = vadd.f32 %v2079_v52, %v983_v6  ;;  %v2458_v7 = vpop.f32.mrb[38].mxu0  ;;  %2483 = vmatprep.mubr.bf16.mxu1 %v1046_v2 }
 0x4fe   :  { %v995_v9 = vadd.f32 %v2458_v7, %v2079_v52  ;;  %v986_v8 = vpop.f32.mrb[39].mxu0  ;;  %2484 = vmatmul.mubr.bf16.vlgmr.msra.gmra.mrb[32].mxu1 %v1047_v1  ;;  %v1036_v11 = vmax.f32 %v992_v5, 0.0 }
 0x4ff   :  { %v987_v10 = vadd.f32 %v2079_v52, %v986_v8  ;;  %v1034_v15 = vmax.f32 %v984_v0, 0.0  ;;  %2532 = vmatpush3.bf16.msra.mxu1 %v2714_v47  ;;  %v2750_v47 = vld [vmem:[#allocation2 + $0x8] sm:$0xff]  }
 0x500   :  { %v1037_v14 = vmax.f32 %v995_v9, 0.0  ;;  %2533 = vmatprep.subr.bf16.mxu1 %v2715_v42 }
 0x501   :  { %v1035_v17 = vmax.f32 %v987_v10, 0.0 }
 0x502   :  { %v1049_v18 = vpack.c.bf16 %v1037_v14, %v1036_v11 }
 0x503   :  { %v1048_v19 = vpack.c.bf16 %v1035_v17, %v1034_v15  ;;  %v2461_v20 = vpop.f32.mrb[40].mxu0  ;;  %2534 = vmatpush3.bf16.msra.mxu1 %v2715_v42  ;;  %v2751_v42 = vld [vmem:[#allocation2 + $0x10] sm:$0xff]  }
 0x504   :  { %v1008_v12 = vadd.f32 %v2461_v20, %v2079_v52  ;;  %v999_v13 = vpop.f32.mrb[41].mxu0  ;;  %2535 = vmatprep.subr.bf16.mxu1 %v2716_v48 }
 0x505   :  { %v1000_v16 = vadd.f32 %v2079_v52, %v999_v13  ;;  %v2462_v22 = vpop.f32.mrb[42].mxu0  ;;  %2487 = vmatprep.mubr.bf16.mxu1 %v1048_v19 }
 0x506   :  { %v1011_v23 = vadd.f32 %v2462_v22, %v2079_v52  ;;  %v1002_v24 = vpop.f32.mrb[43].mxu0  ;;  %2488 = vmatmul.mubr.bf16.gmra.mrb[36].mxu1 %v1049_v18  ;;  %v1040_v26 = vmax.f32 %v1008_v12, 0.0 }
 0x507   :  { %v1003_v25 = vadd.f32 %v2079_v52, %v1002_v24  ;;  %v1038_v30 = vmax.f32 %v1000_v16, 0.0  ;;  %2536 = vmatpush3.bf16.msra.mxu1 %v2716_v48  ;;  %v2752_v48 = vld [vmem:[#allocation2 + $0x18] sm:$0xff]  }
 0x508   :  { %v1041_v27 = vmax.f32 %v1011_v23, 0.0  ;;  %2537 = vmatprep.subr.bf16.mxu1 %v2717_v49 }
 0x509   :  { %v1039_v31 = vmax.f32 %v1003_v25, 0.0 }
 0x50a   :  { %v1051_v32 = vpack.c.bf16 %v1041_v27, %v1040_v26 }
 0x50b   :  { %v1050_v33 = vpack.c.bf16 %v1039_v31, %v1038_v30  ;;  %v2465_v34 = vpop.f32.mrb[44].mxu0  ;;  %2538 = vmatpush3.bf16.msra.mxu1 %v2717_v49  ;;  %v2753_v49 = vld [vmem:[#allocation2 + $0x20] sm:$0xff]  }
 0x50c   :  { %v1024_v35 = vadd.f32 %v2465_v34, %v2079_v52  ;;  %v1015_v36 = vpop.f32.mrb[45].mxu0  ;;  %2539 = vmatprep.subr.bf16.mxu1 %v2718_v50 }
 0x50d   :  { %v1016_v37 = vadd.f32 %v2079_v52, %v1015_v36  ;;  %v2466_v38 = vpop.f32.mrb[46].mxu0  ;;  %2491 = vmatprep.mubr.bf16.mxu1 %v1050_v33 }
 0x50e   :  { %v1027_v29 = vadd.f32 %v2466_v38, %v2079_v52  ;;  %v1018_v39 = vpop.f32.mrb[47].mxu0  ;;  %2492 = vmatmul.mubr.bf16.gmra.mrb[40].mxu1 %v1051_v32  ;;  %v1044_v40 = vmax.f32 %v1024_v35, 0.0 }
 0x50f   :  { %v1019_v28 = vadd.f32 %v2079_v52, %v1018_v39  ;;  %v1042_v44 = vmax.f32 %v1016_v37, 0.0  ;;  %2540 = vmatpush3.bf16.msra.mxu1 %v2718_v50  ;;  %v2089_v52 = vld [vmem:[%s3331_s6 + $0x1] ss:$0 sm:$0xff]  ;;  %v2754_v50 = vld [vmem:[#allocation2 + $0x28] sm:$0xff]  }
 0x510   :  { %v1045_v41 = vmax.f32 %v1027_v29, 0.0  ;;  %2541 = vmatprep.subr.bf16.mxu1 %v2719_v51 }
 0x511   :  { %v1043_v45 = vmax.f32 %v1019_v28, 0.0 }
 0x512   :  { %v1053_v46 = vpack.c.bf16 %v1045_v41, %v1044_v40 }
 0x513   :  { %v1052_v43 = vpack.c.bf16 %v1043_v45, %v1042_v44  ;;  %2542 = vmatpush3.bf16.msra.mxu1 %v2719_v51  ;;  %v2755_v51 = vld [vmem:[#allocation2 + $0x30] sm:$0xff]  }
 0x515   :  { %2495 = vmatprep.mubr.bf16.mxu1 %v1052_v43 }
 0x516   :  { %2496 = vmatmul.mubr.bf16.gmra.mrb[44].mxu1 %v1053_v46 }
 0x5d1   :  { %v2485_v53 = vpop.f32.mrb[32].mxu1 }
 0x5d2   :  { %v1170_v54 = vadd.f32 %v2485_v53, %v2089_v52  ;;  %v1161_v55 = vpop.f32.mrb[33].mxu1  ;;  %v2721_v53 = vld [vmem:[#allocation7 + $0xb8] sm:$0xff]  }
 0x5d3   :  { %v1162_v56 = vadd.f32 %v2089_v52, %v1161_v55  ;;  %v2486_v57 = vpop.f32.mrb[34].mxu1  ;;  %v2723_v55 = vld [vmem:[#allocation8 + $0x88] sm:$0xff]  }
 0x5d4   :  { %v1173_v58 = vadd.f32 %v2486_v57, %v2089_v52  ;;  %v1164_v59 = vpop.f32.mrb[35].mxu1  ;;  %v1226_v61 = vmax.f32 %v1170_v54, 0.0  ;;  %v2722_v54 = vld [vmem:[#allocation8 + $0x80] sm:$0xff]   ;;  %v2725_v57 = vld [vmem:[#allocation8 + $0x98] sm:$0xff]  }
 0x5d5   :  { %v1165_v60 = vadd.f32 %v2089_v52, %v1164_v59  ;;  %v1224_v62 = vmax.f32 %v1162_v56, 0.0  ;;  %v2724_v56 = vld [vmem:[#allocation8 + $0x90] sm:$0xff]  }
 0x5d6   :  { %v1227_v4 = vmax.f32 %v1173_v58, 0.0  ;;  %v2726_v58 = vld [vmem:[#allocation8 + $0xa0] sm:$0xff]  }
 0x5d7   :  { %v1225_v63 = vmax.f32 %v1165_v60, 0.0 }
 0x5d8   :  { %v3227_v1 = vpack.c.bf16 %v1227_v4, %v1226_v61 }
 0x5d9   :  { %v3229_v2 = vpack.c.bf16 %v1225_v63, %v1224_v62  ;;  %v2489_v3 = vpop.f32.mrb[36].mxu1 }
 0x5da   :  { %v1186_v5 = vadd.f32 %v2489_v3, %v2089_v52  ;;  %v1177_v6 = vpop.f32.mrb[37].mxu1 }
 0x5db   :  { %v1178_v0 = vadd.f32 %v2089_v52, %v1177_v6  ;;  %v2490_v7 = vpop.f32.mrb[38].mxu1  ;;  %2499 = vmatprep.subr.bf16.mxu0 %v3229_v2 }
 0x5dc   :  { %v1189_v9 = vadd.f32 %v2490_v7, %v2089_v52  ;;  %v1180_v8 = vpop.f32.mrb[39].mxu1  ;;  %2500 = vmatpush3.bf16.msra.mxu0 %v3229_v2  ;;  %v1230_v11 = vmax.f32 %v1186_v5, 0.0 }
 0x5dd   :  { %v1181_v10 = vadd.f32 %v2089_v52, %v1180_v8  ;;  %2501 = vmatprep.subr.bf16.mxu0 %v3227_v1  ;;  %v1228_v15 = vmax.f32 %v1178_v0, 0.0 }
 0x5de   :  { %v1231_v14 = vmax.f32 %v1189_v9, 0.0 }
 0x5df   :  { %v1229_v17 = vmax.f32 %v1181_v10, 0.0 }
 0x5e0   :  { %v3234_v18 = vpack.c.bf16 %v1231_v14, %v1230_v11  ;;  %2502 = vmatpush3.bf16.msra.mxu0 %v3227_v1 }
 0x5e1   :  { %v3237_v19 = vpack.c.bf16 %v1229_v17, %v1228_v15  ;;  %v2493_v20 = vpop.f32.mrb[40].mxu1 }
 0x5e2   :  { %v1202_v12 = vadd.f32 %v2493_v20, %v2089_v52  ;;  %v1193_v13 = vpop.f32.mrb[41].mxu1 }
 0x5e3   :  { %v1194_v16 = vadd.f32 %v2089_v52, %v1193_v13  ;;  %v2494_v22 = vpop.f32.mrb[42].mxu1  ;;  %2503 = vmatprep.subr.bf16.mxu0 %v3237_v19 }
 0x5e4   :  { %v1205_v23 = vadd.f32 %v2494_v22, %v2089_v52  ;;  %v1196_v24 = vpop.f32.mrb[43].mxu1  ;;  %2504 = vmatpush3.bf16.msra.mxu0 %v3237_v19  ;;  %v1234_v26 = vmax.f32 %v1202_v12, 0.0 }
 0x5e5   :  { %v1197_v25 = vadd.f32 %v2089_v52, %v1196_v24  ;;  %2505 = vmatprep.subr.bf16.mxu0 %v3234_v18  ;;  %v1232_v30 = vmax.f32 %v1194_v16, 0.0 }
 0x5e6   :  { %v1235_v27 = vmax.f32 %v1205_v23, 0.0 }
 0x5e7   :  { %v1233_v31 = vmax.f32 %v1197_v25, 0.0 }
 0x5e8   :  { %v3242_v32 = vpack.c.bf16 %v1235_v27, %v1234_v26  ;;  %2506 = vmatpush3.bf16.msra.mxu0 %v3234_v18 }
 0x5e9   :  { %v3245_v33 = vpack.c.bf16 %v1233_v31, %v1232_v30  ;;  %v2497_v34 = vpop.f32.mrb[44].mxu1  ;;  %v2728_v30 = vld [vmem:[#allocation8 + $0xb0] sm:$0xff]   ;;  %v2729_v31 = vld [vmem:[#allocation8 + $0xb8] sm:$0xff]  }
 0x5ea   :  { %v1218_v35 = vadd.f32 %v2497_v34, %v2089_v52  ;;  %v1209_v36 = vpop.f32.mrb[45].mxu1 }
 0x5eb   :  { %v1210_v37 = vadd.f32 %v2089_v52, %v1209_v36  ;;  %v2498_v38 = vpop.f32.mrb[46].mxu1  ;;  %2507 = vmatprep.subr.bf16.mxu0 %v3245_v33 }
 0x5ec   :  { %v1221_v29 = vadd.f32 %v2498_v38, %v2089_v52  ;;  %v1212_v39 = vpop.f32.mrb[47].mxu1  ;;  %2508 = vmatpush3.bf16.msra.mxu0 %v3245_v33  ;;  %v1238_v40 = vmax.f32 %v1218_v35, 0.0 }
 0x5ed   :  { %v1213_v28 = vadd.f32 %v2089_v52, %v1212_v39  ;;  %2509 = vmatprep.subr.bf16.mxu0 %v3242_v32  ;;  %v1236_v44 = vmax.f32 %v1210_v37, 0.0  ;;  %v2720_v52 = vld [vmem:[#allocation7 + $0xb0] sm:$0xff]  }
 0x5ee   :  { %v1239_v41 = vmax.f32 %v1221_v29, 0.0  ;;  %2543 = vmatprep.subr.bf16.mxu1 %v2720_v52 }
 0x5ef   :  { %v1237_v45 = vmax.f32 %v1213_v28, 0.0  ;;  %2544 = vmatpush3.bf16.msra.mxu1 %v2720_v52 }
 0x5f0   :  { %v3250_v46 = vpack.c.bf16 %v1239_v41, %v1238_v40  ;;  %2510 = vmatpush3.bf16.msra.mxu0 %v3242_v32  ;;  %2545 = vmatprep.subr.bf16.mxu1 %v2721_v53 }
 0x5f1   :  { %v3253_v43 = vpack.c.bf16 %v1237_v45, %v1236_v44 }
 0x5f3   :  { %2511 = vmatprep.subr.bf16.mxu0 %v3253_v43  ;;  %2546 = vmatpush3.bf16.msra.mxu1 %v2721_v53 }
 0x5f4   :  { %2512 = vmatpush3.bf16.msra.mxu0 %v3253_v43 }
 0x5f5   :  { %2513 = vmatprep.subr.bf16.mxu0 %v3250_v46 }
 0x5f8   :  { %2514 = vmatpush3.bf16.msra.mxu0 %v3250_v46 }
 0x5f9   :  { %2563 = vmatprep.subr.bf16.mxu0 %v2722_v54 }
 0x5fb   :  { %2516 = vmatmul.mubr.bf16.vlgmr.msra.gmra.mrb[48].mxu0 %v2750_v47 }
 0x5fc   :  { %2519 = vmatprep.mubr.bf16.mxu0 %v2751_v42  ;;  %2564 = vmatpush3.bf16.msra.mxu0 %v2722_v54 }
 0x5fd   :  { %2565 = vmatprep.subr.bf16.mxu0 %v2723_v55 }
 0x600   :  { %2566 = vmatpush3.bf16.msra.mxu0 %v2723_v55 }
 0x601   :  { %2567 = vmatprep.subr.bf16.mxu0 %v2724_v56 }
 0x603   :  { %2520 = vmatmul.mubr.bf16.gmra.mrb[52].mxu0 %v2752_v48 }
 0x604   :  { %2523 = vmatprep.mubr.bf16.mxu0 %v2753_v49  ;;  %2568 = vmatpush3.bf16.msra.mxu0 %v2724_v56 }
 0x605   :  { %2569 = vmatprep.subr.bf16.mxu0 %v2725_v57 }
 0x608   :  { %2570 = vmatpush3.bf16.msra.mxu0 %v2725_v57 }
 0x609   :  { %2571 = vmatprep.subr.bf16.mxu0 %v2726_v58 }
 0x60b   :  { %2524 = vmatmul.mubr.bf16.gmra.mrb[56].mxu0 %v2754_v50 }
 0x60c   :  { %2527 = vmatprep.mubr.bf16.mxu0 %v2755_v51  ;;  %2572 = vmatpush3.bf16.msra.mxu0 %v2726_v58 }
 0x613   :  { %2528 = vmatmul.mubr.bf16.gmra.mrb[60].mxu0 %v3155_v21  ;;  %v2727_v21 = vld [vmem:[#allocation8 + $0xa8] sm:$0xff]  }
 0x614   :  { %2573 = vmatprep.subr.bf16.mxu0 %v2727_v21 }
 0x615   :  { %2574 = vmatpush3.bf16.msra.mxu0 %v2727_v21 }
 0x616   :  { %2575 = vmatprep.subr.bf16.mxu0 %v2728_v30 }
 0x619   :  { %2576 = vmatpush3.bf16.msra.mxu0 %v2728_v30  ;;  %v2734_v30 = vld [vmem:[#allocation10 + $0x20] sm:$0xff]  }
 0x61a   :  { %2577 = vmatprep.subr.bf16.mxu0 %v2729_v31 }
 0x61d   :  { %2578 = vmatpush3.bf16.msra.mxu0 %v2729_v31  ;;  %v2735_v31 = vld [vmem:[#allocation10 + $0x28] sm:$0xff]  }
 0x6ce   :  { %v2517_v59 = vpop.f32.mrb[48].mxu0 }
 0x6cf   :  { %v1282_v60 = vpop.f32.mrb[49].mxu0 }
 0x6d0   :  { %v2518_v61 = vpop.f32.mrb[50].mxu0 }
 0x6d1   :  { %v1346_v4 = vpack.c.bf16 %v2518_v61, %v2517_v59  ;;  %v1285_v62 = vpop.f32.mrb[51].mxu0 }
 0x6d2   :  { %v1345_v63 = vpack.c.bf16 %v1285_v62, %v1282_v60 }
 0x6d3   :  { %v1354_v5 = vadd.bf16 %v1346_v4, %v3227_v1 }
 0x6d4   :  { %v1353_v3 = vadd.bf16 %v1345_v63, %v3229_v2 }
 0x6d6   :  { %v2521_v6 = vpop.f32.mrb[52].mxu0  ;;  %2547 = vmatprep.mubr.bf16.mxu1 %v1353_v3 }
 0x6d7   :  { %v1298_v0 = vpop.f32.mrb[53].mxu0  ;;  %2548 = vmatmul.mubr.bf16.vlgmr.msra.gmra.mrb[48].mxu1 %v1354_v5 }
 0x6d8   :  { %v2522_v7 = vpop.f32.mrb[54].mxu0 }
 0x6d9   :  { %v1348_v9 = vpack.c.bf16 %v2522_v7, %v2521_v6  ;;  %v1301_v8 = vpop.f32.mrb[55].mxu0 }
 0x6da   :  { %v1347_v10 = vpack.c.bf16 %v1301_v8, %v1298_v0 }
 0x6db   :  { %v1356_v14 = vadd.bf16 %v1348_v9, %v3234_v18 }
 0x6dc   :  { %v1355_v11 = vadd.bf16 %v1347_v10, %v3237_v19 }
 0x6de   :  { %v2525_v15 = vpop.f32.mrb[56].mxu0  ;;  %2551 = vmatprep.mubr.bf16.mxu1 %v1355_v11 }
 0x6df   :  { %v1314_v17 = vpop.f32.mrb[57].mxu0  ;;  %2552 = vmatmul.mubr.bf16.gmra.mrb[52].mxu1 %v1356_v14 }
 0x6e0   :  { %v2526_v20 = vpop.f32.mrb[58].mxu0 }
 0x6e1   :  { %v1350_v2 = vpack.c.bf16 %v2526_v20, %v2525_v15  ;;  %v1317_v12 = vpop.f32.mrb[59].mxu0 }
 0x6e2   :  { %v1349_v1 = vpack.c.bf16 %v1317_v12, %v1314_v17 }
 0x6e3   :  { %v1358_v16 = vadd.bf16 %v1350_v2, %v3242_v32  ;;  %v2099_v32 = vld [vmem:[%s3329_s4 + $0x2] ss:$0 sm:$0xff] }
 0x6e4   :  { %v1357_v13 = vadd.bf16 %v1349_v1, %v3245_v33 }
 0x6e6   :  { %v2529_v22 = vpop.f32.mrb[60].mxu0  ;;  %2555 = vmatprep.mubr.bf16.mxu1 %v1357_v13 }
 0x6e7   :  { %v1330_v23 = vpop.f32.mrb[61].mxu0  ;;  %2556 = vmatmul.mubr.bf16.gmra.mrb[56].mxu1 %v1358_v16 }
 0x6e8   :  { %v2530_v24 = vpop.f32.mrb[62].mxu0 }
 0x6e9   :  { %v1352_v19 = vpack.c.bf16 %v2530_v24, %v2529_v22  ;;  %v1333_v25 = vpop.f32.mrb[63].mxu0 }
 0x6ea   :  { %v1351_v18 = vpack.c.bf16 %v1333_v25, %v1330_v23  ;;  %v2730_v25 = vld [vmem:[#allocation10] sm:$0xff]  }
 0x6eb   :  { %v1360_v27 = vadd.bf16 %v1352_v19, %v3250_v46  ;;  %v2928_v19 = vmov 0.0  }
 0x6ec   :  { %v1359_v26 = vadd.bf16 %v1351_v18, %v3253_v43  ;;  %2595 = vmatprep.subr.bf16.mxu1 %v2928_v19  ;;  %2615 = vmatprep.subr.bf16.mxu0 %v2928_v19  ;;  %v2731_v18 = vld [vmem:[#allocation10 + $0x8] sm:$0xff]  }
 0x6ee   :  { %2559 = vmatprep.mubr.bf16.mxu1 %v1359_v26  ;;  %v2732_v26 = vld [vmem:[#allocation10 + $0x10] sm:$0xff]  }
 0x6ef   :  { %2560 = vmatmul.mubr.bf16.gmra.mrb[60].mxu1 %v1360_v27  ;;  %v2733_v27 = vld [vmem:[#allocation10 + $0x18] sm:$0xff]  }
 0x6f0   :  { %2611 = vmatprep.mubr.msk.bf16.mxu1 %vm2929_vm0, %v2928_v19 }
 0x7aa   :  { %v2549_v33 = vpop.f32.mrb[48].mxu1 }
 0x7ab   :  { %v1477_v34 = vadd.f32 %v2549_v33, %v2099_v32  ;;  %v1468_v35 = vpop.f32.mrb[49].mxu1  ;;  %v2109_v33 = vld [vmem:[%s3331_s6 + $0x2] ss:$0 sm:$0xff] }
 0x7ac   :  { %v1469_v36 = vadd.f32 %v2099_v32, %v1468_v35  ;;  %v2550_v37 = vpop.f32.mrb[50].mxu1 }
 0x7ad   :  { %v1480_v38 = vadd.f32 %v2550_v37, %v2099_v32  ;;  %v1471_v29 = vpop.f32.mrb[51].mxu1  ;;  %v1533_v28 = vmax.f32 %v1477_v34, 0.0 }
 0x7ae   :  { %v1472_v39 = vadd.f32 %v2099_v32, %v1471_v29  ;;  %v1531_v41 = vmax.f32 %v1469_v36, 0.0 }
 0x7af   :  { %v1534_v40 = vmax.f32 %v1480_v38, 0.0 }
 0x7b0   :  { %v1532_v44 = vmax.f32 %v1472_v39, 0.0 }
 0x7b1   :  { %v1548_v45 = vpack.c.bf16 %v1534_v40, %v1533_v28 }
 0x7b2   :  { %v1547_v46 = vpack.c.bf16 %v1532_v44, %v1531_v41  ;;  %v2553_v43 = vpop.f32.mrb[52].mxu1 }
 0x7b3   :  { %v1493_v47 = vadd.f32 %v2553_v43, %v2099_v32  ;;  %v1484_v42 = vpop.f32.mrb[53].mxu1 }
 0x7b4   :  { %v1485_v48 = vadd.f32 %v2099_v32, %v1484_v42  ;;  %v2554_v49 = vpop.f32.mrb[54].mxu1  ;;  %2579 = vmatprep.mubr.bf16.mxu0 %v1547_v46 }
 0x7b5   :  { %v1496_v50 = vadd.f32 %v2554_v49, %v2099_v32  ;;  %v1487_v51 = vpop.f32.mrb[55].mxu1  ;;  %2580 = vmatmul.mubr.bf16.vlgmr.msra.gmra.mrb[64].mxu0 %v1548_v45  ;;  %v1537_v53 = vmax.f32 %v1493_v47, 0.0 }
 0x7b6   :  { %v1488_v52 = vadd.f32 %v2099_v32, %v1487_v51  ;;  %v1535_v55 = vmax.f32 %v1485_v48, 0.0  ;;  %2616 = vmatpush3.bf16.msra.mxu0 %v2730_v25 }
 0x7b7   :  { %v1538_v54 = vmax.f32 %v1496_v50, 0.0  ;;  %2617 = vmatprep.subr.bf16.mxu0 %v2928_v19 }
 0x7b8   :  { %v1536_v56 = vmax.f32 %v1488_v52, 0.0 }
 0x7b9   :  { %v1550_v57 = vpack.c.bf16 %v1538_v54, %v1537_v53 }
 0x7ba   :  { %v1549_v58 = vpack.c.bf16 %v1536_v56, %v1535_v55  ;;  %v2557_v21 = vpop.f32.mrb[56].mxu1  ;;  %2618 = vmatpush3.bf16.msra.mxu0 %v2731_v18  ;;  %v1749_v18 = vld [vmem:[%s3327_s2] sm:$0xf] }
 0x7bb   :  { %v1509_v59 = vadd.f32 %v2557_v21, %v2099_v32  ;;  %v1500_v60 = vpop.f32.mrb[57].mxu1  ;;  %2619 = vmatprep.subr.bf16.mxu0 %v2928_v19 }
 0x7bc   :  { %v1501_v61 = vadd.f32 %v2099_v32, %v1500_v60  ;;  %v2558_v4 = vpop.f32.mrb[58].mxu1  ;;  %2583 = vmatprep.mubr.bf16.mxu0 %v1549_v58 }
 0x7bd   :  { %v1512_v62 = vadd.f32 %v2558_v4, %v2099_v32  ;;  %v1503_v63 = vpop.f32.mrb[59].mxu1  ;;  %2584 = vmatmul.mubr.bf16.gmra.mrb[68].mxu0 %v1550_v57  ;;  %v1541_v5 = vmax.f32 %v1509_v59, 0.0 }
 0x7be   :  { %v1504_v3 = vadd.f32 %v2099_v32, %v1503_v63  ;;  %v1539_v0 = vmax.f32 %v1501_v61, 0.0  ;;  %2620 = vmatpush3.bf16.msra.mxu0 %v2732_v26  ;;  %v2737_v26 = vld [vmem:[#allocation10 + $0x38] sm:$0xff]  }
 0x7bf   :  { %v1542_v6 = vmax.f32 %v1512_v62, 0.0  ;;  %2621 = vmatprep.subr.bf16.mxu0 %v2928_v19 }
 0x7c0   :  { %v1540_v7 = vmax.f32 %v1504_v3, 0.0 }
 0x7c1   :  { %v1552_v9 = vpack.c.bf16 %v1542_v6, %v1541_v5 }
 0x7c2   :  { %v1551_v8 = vpack.c.bf16 %v1540_v7, %v1539_v0  ;;  %v2561_v10 = vpop.f32.mrb[60].mxu1  ;;  %2622 = vmatpush3.bf16.msra.mxu0 %v2733_v27  ;;  %v2738_v27 = vld [vmem:[#allocation11] sm:$0xff]  }
 0x7c3   :  { %v1525_v11 = vadd.f32 %v2561_v10, %v2099_v32  ;;  %v1516_v14 = vpop.f32.mrb[61].mxu1  ;;  %2623 = vmatprep.subr.bf16.mxu0 %v2928_v19 }
 0x7c4   :  { %v1517_v15 = vadd.f32 %v2099_v32, %v1516_v14  ;;  %v2562_v17 = vpop.f32.mrb[62].mxu1  ;;  %2587 = vmatprep.mubr.bf16.mxu0 %v1551_v8 }
 0x7c5   :  { %v1528_v20 = vadd.f32 %v2562_v17, %v2099_v32  ;;  %v1519_v2 = vpop.f32.mrb[63].mxu1  ;;  %2588 = vmatmul.mubr.bf16.gmra.mrb[72].mxu0 %v1552_v9  ;;  %v1545_v1 = vmax.f32 %v1525_v11, 0.0 }
 0x7c6   :  { %v1520_v12 = vadd.f32 %v2099_v32, %v1519_v2  ;;  %v1543_v16 = vmax.f32 %v1517_v15, 0.0  ;;  %2624 = vmatpush3.bf16.msra.mxu0 %v2734_v30  ;;  %v2736_v32 = vld [vmem:[#allocation10 + $0x30] sm:$0xff]   ;;  %v2739_v30 = vld [vmem:[#allocation11 + $0x8] sm:$0xff]  }
 0x7c7   :  { %v1546_v13 = vmax.f32 %v1528_v20, 0.0  ;;  %2625 = vmatprep.subr.bf16.mxu0 %v2928_v19 }
 0x7c8   :  { %v1544_v22 = vmax.f32 %v1520_v12, 0.0 }
 0x7c9   :  { %v1554_v23 = vpack.c.bf16 %v1546_v13, %v1545_v1 }
 0x7ca   :  { %v1553_v24 = vpack.c.bf16 %v1544_v22, %v1543_v16  ;;  %2626 = vmatpush3.bf16.msra.mxu0 %v2735_v31  ;;  %v2740_v31 = vld [vmem:[#allocation11 + $0x10] sm:$0xff]  }
 0x7cb   :  { %2627 = vmatprep.subr.bf16.mxu0 %v2928_v19 }
 0x7cc   :  { %2591 = vmatprep.mubr.bf16.mxu0 %v1553_v24 }
 0x7cd   :  { %2592 = vmatmul.mubr.bf16.gmra.mrb[76].mxu0 %v1554_v23 }
 0x7ce   :  { %2631 = vmatprep.mubr.msk.bf16.mxu0 %vm2929_vm0, %v2928_v19  ;;  %2628 = vmatpush3.bf16.msra.mxu0 %v2736_v32  ;;  %v2741_v32 = vld [vmem:[#allocation11 + $0x18] sm:$0xff]  }
 0x7cf   :  { %2629 = vmatprep.subr.bf16.mxu0 %v2928_v19 }
 0x7d2   :  { %2630 = vmatpush3.bf16.msra.mxu0 %v2737_v26 }
 0x888   :  { %v2581_v34 = vpop.f32.mrb[64].mxu0 }
 0x889   :  { %v1671_v35 = vadd.f32 %v2581_v34, %v2109_v33  ;;  %v1662_v36 = vpop.f32.mrb[65].mxu0  ;;  %v2743_v34 = vld [vmem:[#allocation11 + $0x28] sm:$0xff]  }
 0x88a   :  { %v1663_v37 = vadd.f32 %v2109_v33, %v1662_v36  ;;  %v2582_v38 = vpop.f32.mrb[66].mxu0 }
 0x88b   :  { %v1674_v29 = vadd.f32 %v2582_v38, %v2109_v33  ;;  %v1665_v39 = vpop.f32.mrb[67].mxu0  ;;  %v1727_v40 = vmax.f32 %v1671_v35, 0.0 }
 0x88c   :  { %v1666_v28 = vadd.f32 %v2109_v33, %v1665_v39  ;;  %v1725_v44 = vmax.f32 %v1663_v37, 0.0  ;;  %v2744_v39 = vld [vmem:[#allocation11 + $0x30] sm:$0xff]  }
 0x88d   :  { %v1728_v41 = vmax.f32 %v1674_v29, 0.0 }
 0x88e   :  { %v1726_v45 = vmax.f32 %v1666_v28, 0.0  ;;  %v2745_v28 = vld [vmem:[#allocation11 + $0x38] sm:$0xff]  }
 0x88f   :  { %v1742_v46 = vpack.c.bf16 %v1728_v41, %v1727_v40  ;;  %v2118_v40 = vld [vmem:[%s3333_s8] ss:$0 sm:$0xff]  ;;  %s2930_s8 = smov [#allocation13]  }
 0x890   :  { %v1741_v43 = vpack.c.bf16 %v1726_v45, %v1725_v44  ;;  %v2585_v47 = vpop.f32.mrb[68].mxu0  ;;  %s2032_s1 = sshll.u32 %s2930_s8, 4  ;;  %s2033_s1 = int_to_ptr.vmem [resolvable:$true] %s2032_s1 }
 0x891   :  { %v1687_v42 = vadd.f32 %v2585_v47, %v2109_v33  ;;  %v1678_v48 = vpop.f32.mrb[69].mxu0  ;;  %p2893_p7 = scmp.lt.s32.totalorder %s2033_s1, %s2033_s1 }
 0x892   :  { %v1679_v49 = vadd.f32 %v2109_v33, %v1678_v48  ;;  %v2586_v50 = vpop.f32.mrb[70].mxu0  ;;  %2596 = vmatpush3.bf16.msra.mxu1 %v1741_v43  ;;  %v2127_v48 = vld [vmem:[%s3335_s10] ss:$0 sm:$0xff]  ;;  %s2888_s10 = scalar_lea.vmem %s2033_s1, 128 }
 0x893   :  { %v1690_v51 = vadd.f32 %v2586_v50, %v2109_v33  ;;  %v1681_v52 = vpop.f32.mrb[71].mxu0  ;;  %2597 = vmatprep.subr.bf16.mxu1 %v2928_v19  ;;  %v1731_v54 = vmax.f32 %v1687_v42, 0.0  ;;  %p2889_p6 = scmp.ne.s32.totalorder %s2033_s1, %s2888_s10  ;;  %p2894_p8 = scmp.lt.s32.totalorder %s2888_s10, %s2888_s10 }
 0x894   :  { %v1682_v53 = vadd.f32 %v2109_v33, %v1681_v52  ;;  %v1729_v56 = vmax.f32 %v1679_v49, 0.0 }
 0x895   :  { %v1732_v55 = vmax.f32 %v1690_v51, 0.0  ;;  %p2895_p9 = por %p2894_p8, %p2893_p7 }
 0x896   :  { %v1730_v57 = vmax.f32 %v1682_v53, 0.0  ;;  %2598 = vmatpush3.bf16.msra.mxu1 %v1742_v46 }
 0x897   :  { %v1744_v58 = vpack.c.bf16 %v1732_v55, %v1731_v54  ;;  %2599 = vmatprep.subr.bf16.mxu1 %v2928_v19  ;;  %p2896_p10 = pnand %p2895_p9, %p2889_p6 }
 0x898   :  { %v1743_v21 = vpack.c.bf16 %v1730_v57, %v1729_v56  ;;  %v2589_v59 = vpop.f32.mrb[72].mxu0 }
 0x899   :  { %v1703_v60 = vadd.f32 %v2589_v59, %v2109_v33  ;;  %v1694_v61 = vpop.f32.mrb[73].mxu0 }
 0x89a   :  { %v1695_v4 = vadd.f32 %v2109_v33, %v1694_v61  ;;  %v2590_v62 = vpop.f32.mrb[74].mxu0  ;;  %2600 = vmatpush3.bf16.msra.mxu1 %v1743_v21 }
 0x89b   :  { %v1706_v63 = vadd.f32 %v2590_v62, %v2109_v33  ;;  %v1697_v3 = vpop.f32.mrb[75].mxu0  ;;  %2601 = vmatprep.subr.bf16.mxu1 %v2928_v19  ;;  %v1735_v6 = vmax.f32 %v1703_v60, 0.0 }
 0x89c   :  { %v1698_v5 = vadd.f32 %v2109_v33, %v1697_v3  ;;  %v1733_v7 = vmax.f32 %v1695_v4, 0.0 }
 0x89d   :  { %v1736_v0 = vmax.f32 %v1706_v63, 0.0 }
 0x89e   :  { %v1734_v9 = vmax.f32 %v1698_v5, 0.0  ;;  %2602 = vmatpush3.bf16.msra.mxu1 %v1744_v58 }
 0x89f   :  { %v1746_v8 = vpack.c.bf16 %v1736_v0, %v1735_v6  ;;  %2603 = vmatprep.subr.bf16.mxu1 %v2928_v19 }
 0x8a0   :  { %v1745_v10 = vpack.c.bf16 %v1734_v9, %v1733_v7  ;;  %v2593_v11 = vpop.f32.mrb[76].mxu0 }
 0x8a1   :  { %v1719_v14 = vadd.f32 %v2593_v11, %v2109_v33  ;;  %v1710_v15 = vpop.f32.mrb[77].mxu0 }
 0x8a2   :  { %v1711_v17 = vadd.f32 %v2109_v33, %v1710_v15  ;;  %v2594_v20 = vpop.f32.mrb[78].mxu0  ;;  %2604 = vmatpush3.bf16.msra.mxu1 %v1745_v10 }
 0x8a3   :  { %v1722_v2 = vadd.f32 %v2594_v20, %v2109_v33  ;;  %v1713_v12 = vpop.f32.mrb[79].mxu0  ;;  %2605 = vmatprep.subr.bf16.mxu1 %v2928_v19  ;;  %v1739_v13 = vmax.f32 %v1719_v14, 0.0 }
 0x8a4   :  { %v1714_v1 = vadd.f32 %v2109_v33, %v1713_v12  ;;  %v1737_v22 = vmax.f32 %v1711_v17, 0.0  ;;  %v2742_v33 = vld [vmem:[#allocation11 + $0x20] sm:$0xff]  }
 0x8a5   :  { %v1740_v16 = vmax.f32 %v1722_v2, 0.0 }
 0x8a6   :  { %v1738_v23 = vmax.f32 %v1714_v1, 0.0  ;;  %2606 = vmatpush3.bf16.msra.mxu1 %v1746_v8 }
 0x8a7   :  { %v1748_v24 = vpack.c.bf16 %v1740_v16, %v1739_v13  ;;  %2607 = vmatprep.subr.bf16.mxu1 %v2928_v19 }
 0x8a8   :  { %v1747_v25 = vpack.c.bf16 %v1738_v23, %v1737_v22 }
 0x8aa   :  { %2608 = vmatpush3.bf16.msra.mxu1 %v1747_v25 }
 0x8ab   :  { %2609 = vmatprep.subr.bf16.mxu1 %v2928_v19 }
 0x8ae   :  { %2610 = vmatpush3.bf16.msra.mxu1 %v1748_v24 }
 0x8af   :  { %2635 = vmatprep.subr.bf16.mxu1 %v2928_v19 }
 0x8b1   :  { %2612 = vmatmul.mubr.bf16.vlgmr.msra.gmra.mrb[64].mxu1 %v1749_v18 }
 0x8b2   :  { %2651 = vmatprep.mubr.msk.bf16.mxu1 %vm2929_vm0, %v2928_v19  ;;  %2636 = vmatpush3.bf16.msra.mxu1 %v2738_v27 }
 0x8b3   :  { %2637 = vmatprep.subr.bf16.mxu1 %v2928_v19 }
 0x8b6   :  { %2638 = vmatpush3.bf16.msra.mxu1 %v2739_v30 }
 0x8b7   :  { %2639 = vmatprep.subr.bf16.mxu1 %v2928_v19 }
 0x8ba   :  { %2640 = vmatpush3.bf16.msra.mxu1 %v2740_v31 }
 0x8bb   :  { %2641 = vmatprep.subr.bf16.mxu1 %v2928_v19 }
 0x8be   :  { %2642 = vmatpush3.bf16.msra.mxu1 %v2741_v32 }
 0x8bf   :  { %2643 = vmatprep.subr.bf16.mxu1 %v2928_v19 }
 0x8c2   :  { %2644 = vmatpush3.bf16.msra.mxu1 %v2742_v33 }
 0x8c3   :  { %2645 = vmatprep.subr.bf16.mxu1 %v2928_v19 }
 0x8c6   :  { %2646 = vmatpush3.bf16.msra.mxu1 %v2743_v34 }
 0x8c7   :  { %2647 = vmatprep.subr.bf16.mxu1 %v2928_v19 }
 0x8ca   :  { %2648 = vmatpush3.bf16.msra.mxu1 %v2744_v39 }
 0x8cb   :  { %2649 = vmatprep.subr.bf16.mxu1 %v2928_v19 }
 0x8ce   :  { %2650 = vmatpush3.bf16.msra.mxu1 %v2745_v28 }
 0x984   :  { %v1784_v35 = vpop.f32.mrb[64].mxu1 }
 0x985   :  { %v1790_v36 = vpack.c.bf16 %v1784_v35, %v1784_v35  ;;  %v2613_v37 = vpop.f32.mrb[65].mxu1 }
 0x986   :  { %v1787_v38 = vpop.f32.mrb[66].mxu1 }
 0x987   :  { %v2614_v29 = vpop.f32.mrb[67].mxu1  ;;  %2632 = vmatmul.mubr.bf16.vlgmr.msra.gmra.mrb[80].mxu0 %v1790_v36 }
 0xa5a   :  { %v1896_v41 = vpop.f32.mrb[80].mxu0 }
 0xa5b   :  { %v1897_v44 = vadd.f32 %v2118_v40, %v1896_v41  ;;  %v2633_v45 = vpop.f32.mrb[81].mxu0 }
 0xa5c   :  { %v1899_v46 = vpop.f32.mrb[82].mxu0 }
 0xa5d   :  { %v1902_v43 = vmax.f32 %v1897_v44, 0.0  ;;  %v2634_v47 = vpop.f32.mrb[83].mxu0 }
 0xa5f   :  { %v1903_v42 = vpack.c.bf16 %v1902_v43, %v1902_v43 }
 0xa61   :  { %2652 = vmatmul.mubr.bf16.vlgmr.msra.gmra.mrb[68].mxu1 %v1903_v42 }
 0xb34   :  { %v2009_v49 = vpop.f32.mrb[68].mxu1 }
 0xb35   :  { %v2010_v19 = vadd.f32 %v2127_v48, %v2009_v49  ;;  %v2653_v50 = vpop.f32.mrb[69].mxu1 }
 0xb36   :  { %v2012_v51 = vpop.f32.mrb[70].mxu1 }
 0xb37   :  { %2015 = vmax.xlane.f32.xlu0 %v2010_v19  ;;  %v2654_v52 = vpop.f32.mrb[71].mxu1 }
 0xbc4   :  { %v2016_v53 = vpop.xlane.xlu0 %2015 }
 0xbc5   :  { %v2017_v54 = vsub.f32 %v2010_v19, %v2016_v53 }
 0xbc7   :  { %v2018_v55 = vmul.f32 1.442695, %v2017_v54 }
 0xbc9   :  { %2746 = vpow2.f32 %v2018_v55 }
 0xbd3   :  { %v2747_v56 = vpop.eup %2746 }
 0xbd4   :  { %2020 = vadd.xlane.f32.xlu0 %v2747_v56 }
 0xc61   :  { %v2021_v57 = vpop.xlane.xlu0 %2020 }
 0xc62   :  { %2748 = vlog2.f32 %v2021_v57 }
 0xc6c   :  { %v2749_v58 = vpop.eup %2748 }
 0xc6d   :  { %v2023_v21 = vmul.f32 0.6931472, %v2749_v58 }
 0xc6f   :  { %v2024_v59 = vsub.f32 %v2017_v54, %v2023_v21 }
 0xc71   :  { %2025 = vst [vmem:[#allocation13] sm:$0xff] %v2024_v59 }
 0xc72   :  { %2899 = shalt.err (!%p2896_p10)
}
 0xc73   :  { %s2900_s26 = scalar_lea.hbm %s3336_s11, 128 }
 0xc74   :  { %p2901_p11 = scmp.ne.s32.totalorder %s3336_s11, %s2900_s26  ;;  %p2904_p12 = scmp.lt.u32.totalorder %s2900_s26, %s3336_s11 }
 0xc76   :  { %p2906_p13 = pnand %p2904_p12, %p2901_p11 }
 0xc78   :  { %2909 = shalt.err (!%p2906_p13)
}
 0xc79   :  { %2035 = dma.vmem_to_hbm [thread:$0]  %s2033_s1, 128, %s3336_s11, [#allocation4]  }
 0xc7a   :  { %2918 = dma.done.wait [#allocation4], 128  }
 0xc7b   :  { %2919 = vsyncadd [#allocation4], 4294967168 }
 0xc7c   :  { %2039 = vsyncpa [#allocation3], 1 }
 0xc7d   :  { %2040 = vsyncpa [#allocation6], 1 }
 0xc7e   :  { %2041 = vsyncpa [#allocation9], 1 }
 0xc7f   :  { %2042 = vsyncpa [#allocation12], 1 }
 0xc80   :  { %2043 = vsyncpa [#allocation4], 1 }

</bundles_post_ra>
